<compile_context>
chip_gen: v5e
topology: v5e:2x2
jax: 0.10.0
libtpu: 0.0.40
codegen_flags: <defaults>
</compile_context>

<pallas_src>
import functools

import jax
import jax.numpy as jnp
from jax import lax
from jax.experimental import pallas as pl
from jax.experimental.pallas import tpu as pltpu


def _round_up(n, m):
    return ((n + m - 1) // m) * m


# -----------------------------------------------------------------------------
# Kernel
# -----------------------------------------------------------------------------
def encode_kernel(x_ref, wih_ref, whh_ref, b_ref, wheads_ref, bheads_ref,
                  heads_ref, h_ref, c_ref, gx_ref,
                  *, ts, b_pad, h_pad, seq_len, unroll):
    """One time-chunk of the LSTM recurrence (+ fused output heads on last chunk).

    x_ref      : (Ts*Bp, D)   bf16 current time-chunk, batch-major within each step
    wih_ref    : (D, 4*Hp)    bf16 input->gates weights, gate order (i, f, o, g)
    whh_ref    : (Hp, 4*Hp)   bf16 hidden->gates weights
    b_ref      : (1, 4*Hp)    f32  combined bias (b_ih + b_hh)
    wheads_ref : (Hp, 2*Zp)   bf16 [fc21 | fc22] fused
    bheads_ref : (1, 2*Zp)    f32
    heads_ref  : (Bp, 2*Zp)   f32 output, written only on the last grid step
    h_ref/c_ref: (Bp, Hp)     f32 VMEM scratch, persists across grid steps
    gx_ref     : (Ts*Bp, 4Hp) f32 VMEM scratch for the chunk's input pre-activations
    """
    chunk = pl.program_id(0)
    has_tail = (seq_len % ts) != 0          # static Python bool

    @pl.when(chunk == 0)
    def _init():
        h_ref[...] = jnp.zeros_like(h_ref)
        c_ref[...] = jnp.zeros_like(c_ref)

    # Phase 1: one bf16 MXU matmul for the whole chunk's input projection,
    # f32 accumulation, bias broadcast once per chunk.  Stored to VMEM scratch so
    # the recurrence loop reads small (Bp, 4Hp) slices instead of keeping a huge
    # SSA value live.
    gx_ref[...] = (jnp.dot(x_ref[...], wih_ref[...],
                           preferred_element_type=jnp.float32)
                   + b_ref[...])                                   # (Ts*Bp, 4*Hp)

    chunk_base = chunk * ts

    # Phase 2: serial recurrence over the chunk (fori_loop with modest unroll;
    # slice offsets are flagged as multiples of the sublane tile).
    def step(t, carry):
        off = pl.multiple_of(t * b_pad, b_pad)
        gates = (gx_ref[pl.ds(off, b_pad), :]
                 + jnp.dot(h_ref[...].astype(jnp.bfloat16), whh_ref[...],
                           preferred_element_type=jnp.float32))    # (Bp, 4*Hp) f32
        sig = jax.nn.sigmoid(gates[:, :3 * h_pad])   # i, f, o in one EUP slab
        i_g = sig[:, 0 * h_pad:1 * h_pad]
        f_g = sig[:, 1 * h_pad:2 * h_pad]
        o_g = sig[:, 2 * h_pad:3 * h_pad]
        g_g = jnp.tanh(gates[:, 3 * h_pad:4 * h_pad])
        c_new = f_g * c_ref[...] + i_g * g_g
        h_new = o_g * jnp.tanh(c_new)
        if has_tail:
            # Masked ragged tail: padded timesteps leave h/c untouched.
            valid = (chunk_base + t) < seq_len
            c_new = jnp.where(valid, c_new, c_ref[...])
            h_new = jnp.where(valid, h_new, h_ref[...])
        c_ref[...] = c_new
        h_ref[...] = h_new
        return carry

    lax.fori_loop(0, ts, step, 0, unroll=unroll)

    @pl.when(chunk == pl.num_programs(0) - 1)
    def _finalize():
        heads = (jnp.dot(h_ref[...].astype(jnp.bfloat16), wheads_ref[...],
                         preferred_element_type=jnp.float32)
                 + bheads_ref[...])
        heads_ref[...] = heads.astype(heads_ref.dtype)


# -----------------------------------------------------------------------------
# Wrapper
# -----------------------------------------------------------------------------
def encode_forward(x, params, *, time_chunk=None):
    """x: (S, B, D) float32 -> (mu, logvar), each (B, Z) float32."""
    S, B, D = x.shape
    H = params["hidden_dim"]
    Z = params["z_dim"]

    b_pad = _round_up(B, 8)
    h_pad = _round_up(H, 128)
    z_pad = _round_up(Z, 128)

    # --- time-chunk sizing: big enough to fill the MXU / amortize per-step
    # overhead (Ts*Bp >= ~512 rows), capped by a VMEM budget for the gx scratch.
    if time_chunk is None:
        time_chunk = max(16, 512 // b_pad)
    gx_row_bytes = b_pad * 4 * h_pad * 4
    max_ts_by_vmem = max(1, (8 << 20) // gx_row_bytes)
    ts = max(1, min(S, time_chunk, max_ts_by_vmem))
    n_chunks = -(-S // ts)                     # ceil
    s_pad = n_chunks * ts
    unroll = max(1, min(ts, 8))

    # Pad batch to a sublane multiple and time to a whole number of chunks
    # (padded steps are masked out in-kernel), then flatten (time, batch) so each
    # streamed chunk is one lane-dense 2-D tile feeding one MXU matmul.
    x_p = jnp.pad(x, ((0, s_pad - S), (0, b_pad - B), (0, 0)))        # (Sp, Bp, D)
    x2d = x_p.reshape(s_pad * b_pad, D).astype(jnp.bfloat16)

    wih = params["w_ih_t"]        # (D, 4*Hp)   bf16
    whh = params["w_hh_t"]        # (Hp, 4*Hp)  bf16
    bg = params["b_gates"]        # (1, 4*Hp)   f32
    wheads = params["w_heads_t"]  # (Hp, 2*Zp)  bf16
    bheads = params["b_heads"]    # (1, 2*Zp)   f32

    # --- VMEM budgeting: derive the limit from the chip's actual capacity
    # (128 MiB on v5e/v6e, 64 MiB on v7x) instead of a hard 64 MiB clamp.
    bf16_b, f32_b = 2, 4
    resident = (2 * ts * b_pad * D * bf16_b                       # x double-buffered
                + 2 * (wih.size + whh.size + wheads.size) * bf16_b  # weights (2 bufs)
                + 2 * (bg.size + bheads.size) * f32_b             # biases (2 bufs)
                + (2 * b_pad * h_pad + ts * b_pad * 4 * h_pad) * f32_b  # h/c + gx
                + b_pad * 2 * z_pad * f32_b)                      # resident output
    try:
        phys_vmem = int(pltpu.get_tpu_info().vmem_capacity_bytes)
    except Exception:
        phys_vmem = 64 << 20
    vmem_cap = int(phys_vmem * 0.85)
    vmem_limit = int(min(max(2 * resident, 16 << 20), vmem_cap))

    flops = (2 * s_pad * b_pad * (D + h_pad) * 4 * h_pad
             + 2 * b_pad * h_pad * 2 * z_pad)
    transcendentals = 5 * s_pad * b_pad * h_pad   # 3 sigmoids + 2 tanh per step/elem
    bytes_accessed = (x2d.size * bf16_b
                      + (wih.size + whh.size + wheads.size) * bf16_b
                      + (bg.size + bheads.size) * f32_b
                      + b_pad * 2 * z_pad * f32_b)

    kernel = functools.partial(encode_kernel, ts=ts, b_pad=b_pad, h_pad=h_pad,
                               seq_len=S, unroll=unroll)

    heads = pl.pallas_call(
        kernel,
        out_shape=jax.ShapeDtypeStruct((b_pad, 2 * z_pad), jnp.float32),
        grid_spec=pltpu.PrefetchScalarGridSpec(
            num_scalar_prefetch=0,
            grid=(n_chunks,),
            in_specs=[
                pl.BlockSpec((ts * b_pad, D), lambda s: (s, 0)),       # x chunk
                pl.BlockSpec((D, 4 * h_pad), lambda s: (0, 0)),        # W_ih
                pl.BlockSpec((h_pad, 4 * h_pad), lambda s: (0, 0)),    # W_hh
                pl.BlockSpec((1, 4 * h_pad), lambda s: (0, 0)),        # bias
                pl.BlockSpec((h_pad, 2 * z_pad), lambda s: (0, 0)),    # W_heads
                pl.BlockSpec((1, 2 * z_pad), lambda s: (0, 0)),        # b_heads
            ],
            out_specs=pl.BlockSpec((b_pad, 2 * z_pad), lambda s: (0, 0)),
            scratch_shapes=[
                pltpu.VMEM((b_pad, h_pad), jnp.float32),               # h state
                pltpu.VMEM((b_pad, h_pad), jnp.float32),               # c state
                pltpu.VMEM((ts * b_pad, 4 * h_pad), jnp.float32),      # gx chunk
            ],
        ),
        compiler_params=pltpu.CompilerParams(
            dimension_semantics=("arbitrary",),            # time is a recurrence
            vmem_limit_bytes=vmem_limit,
        ),
        cost_estimate=pl.CostEstimate(
            flops=int(flops),
            transcendentals=int(transcendentals),
            bytes_accessed=int(bytes_accessed),
        ),
    )(x2d, wih, whh, bg, wheads, bheads)

    mu = heads[:B, :Z]
    logvar = heads[:B, z_pad:z_pad + Z]
    return mu, logvar


# -----------------------------------------------------------------------------
# Parameters: raw PyTorch-layout init + kernel-layout preparation
# -----------------------------------------------------------------------------
def init_raw_params(key, x_dim, z_dim, hidden_dim):
    """PyTorch-layout parameters (gate order i, f, g, o)."""
    ks = jax.random.split(key, 6)
    stdv = 1.0 / float(hidden_dim) ** 0.5   # PyTorch LSTM default init range
    initrange = 0.1                          # from Encode.init_weights()
    return {
        "w_ih": jax.random.uniform(ks[0], (4 * hidden_dim, x_dim),
                                   minval=-stdv, maxval=stdv, dtype=jnp.float32),
        "w_hh": jax.random.uniform(ks[1], (4 * hidden_dim, hidden_dim),
                                   minval=-stdv, maxval=stdv, dtype=jnp.float32),
        "b_ih": jax.random.uniform(ks[2], (4 * hidden_dim,),
                                   minval=-stdv, maxval=stdv, dtype=jnp.float32),
        "b_hh": jax.random.uniform(ks[3], (4 * hidden_dim,),
                                   minval=-stdv, maxval=stdv, dtype=jnp.float32),
        "w21": jax.random.uniform(ks[4], (z_dim, hidden_dim),
                                  minval=-initrange, maxval=initrange, dtype=jnp.float32),
        "w22": jax.random.uniform(ks[5], (z_dim, hidden_dim),
                                  minval=-initrange, maxval=initrange, dtype=jnp.float32),
        "b21": jnp.zeros((z_dim,), jnp.float32),
        "b22": jnp.zeros((z_dim,), jnp.float32),
    }


def prepare_kernel_params(raw):
    """Reorder gates (i,f,g,o)->(i,f,o,g), transpose, zero-pad to lane tiles,
    fuse the two heads, and cast matmul operands to bf16 (MXU-native)."""
    H = raw["w_hh"].shape[1]
    D = raw["w_ih"].shape[1]
    Z = raw["w21"].shape[0]
    h_pad = _round_up(H, 128)
    z_pad = _round_up(Z, 128)

    perm = jnp.array([0, 1, 3, 2])   # (i, f, g, o) -> (i, f, o, g)

    def gate_reorder(m):
        return m.reshape(4, H, *m.shape[1:])[perm]

    w_ih_g = gate_reorder(raw["w_ih"])                       # (4, H, D)
    w_hh_g = gate_reorder(raw["w_hh"])                       # (4, H, H)
    b_g = gate_reorder(raw["b_ih"] + raw["b_hh"])            # (4, H)

    # Zero-pad H so padded hidden columns stay exactly 0 through the recurrence.
    w_ih_g = jnp.pad(w_ih_g, ((0, 0), (0, h_pad - H), (0, 0)))
    w_hh_g = jnp.pad(w_hh_g, ((0, 0), (0, h_pad - H), (0, h_pad - H)))
    b_g = jnp.pad(b_g, ((0, 0), (0, h_pad - H)))

    w21_t = jnp.pad(raw["w21"].T, ((0, h_pad - H), (0, z_pad - Z)))   # (Hp, Zp)
    w22_t = jnp.pad(raw["w22"].T, ((0, h_pad - H), (0, z_pad - Z)))
    b21 = jnp.pad(raw["b21"], (0, z_pad - Z))
    b22 = jnp.pad(raw["b22"], (0, z_pad - Z))

    return {
        "hidden_dim": H,
        "z_dim": Z,
        # bf16 matmul operands, f32 biases (added to f32 accumulators in-kernel).
        "w_ih_t": w_ih_g.reshape(4 * h_pad, D).T.astype(jnp.bfloat16),    # (D, 4*Hp)
        "w_hh_t": w_hh_g.reshape(4 * h_pad, h_pad).T.astype(jnp.bfloat16),  # (Hp, 4*Hp)
        "b_gates": b_g.reshape(1, 4 * h_pad).astype(jnp.float32),         # (1, 4*Hp)
        "w_heads_t": jnp.concatenate([w21_t, w22_t], axis=1).astype(jnp.bfloat16),
        "b_heads": jnp.concatenate([b21, b22]).reshape(1, 2 * z_pad).astype(jnp.float32),
    }


# -----------------------------------------------------------------------------
# Pure-JAX reference (PyTorch semantics, raw f32 weight layout)
# -----------------------------------------------------------------------------
def encode_reference(x, raw):
    H = raw["w_hh"].shape[1]
    B = x.shape[1]
    h = jnp.zeros((B, H), jnp.float32)
    c = jnp.zeros((B, H), jnp.float32)
    w_ih_t = raw["w_ih"].T
    w_hh_t = raw["w_hh"].T
    b = (raw["b_ih"] + raw["b_hh"])[None, :]

    def step(carry, x_t):
        h, c = carry
        gates = x_t @ w_ih_t + h @ w_hh_t + b
        i = jax.nn.sigmoid(gates[:, 0 * H:1 * H])
        f = jax.nn.sigmoid(gates[:, 1 * H:2 * H])
        g = jnp.tanh(gates[:, 2 * H:3 * H])
        o = jax.nn.sigmoid(gates[:, 3 * H:4 * H])
        c = f * c + i * g
        h = o * jnp.tanh(c)
        return (h, c), None

    (h, c), _ = lax.scan(step, (h, c), x)
    mu = h @ raw["w21"].T + raw["b21"]
    logvar = h @ raw["w22"].T + raw["b22"]
    return mu, logvar


# -----------------------------------------------------------------------------
if __name__ == "__main__":
    # Small shapes consistent with the module's forward: (seq, batch, x_dim).
    batch, x_dim = 2, 16
    hidden_dim, z_dim = 32, 8

    key = jax.random.PRNGKey(0)
    k_x, k_x2, k_p = jax.random.split(key, 3)
    raw = init_raw_params(k_p, x_dim, z_dim, hidden_dim)
    params = prepare_kernel_params(raw)

    # bf16 MXU operands with f32 accumulation -> relaxed tolerance.
    atol = rtol = 2e-2

    # Case 1: seq divisible by chunk (time_chunk=4 -> 2 grid steps: exercises
    # streamed chunks + persistent h/c scratch).
    seq_len = 8
    x = jax.random.normal(k_x, (seq_len, batch, x_dim), dtype=jnp.float32)
    mu, logvar = encode_forward(x, params, time_chunk=4)
    mu, logvar = jax.block_until_ready((mu, logvar))
    mu_ref, logvar_ref = encode_reference(x, raw)
    assert mu.shape == (batch, z_dim) and logvar.shape == (batch, z_dim)
    assert jnp.allclose(mu, mu_ref, atol=atol, rtol=rtol), \
        float(jnp.max(jnp.abs(mu - mu_ref)))
    assert jnp.allclose(logvar, logvar_ref, atol=atol, rtol=rtol), \
        float(jnp.max(jnp.abs(logvar - logvar_ref)))

    # Case 2: ragged sequence (S=7 with time_chunk=4 -> masked tail chunk).
    seq_len2 = 7
    x2 = jax.random.normal(k_x2, (seq_len2, batch, x_dim), dtype=jnp.float32)
    mu2, logvar2 = encode_forward(x2, params, time_chunk=4)
    mu2, logvar2 = jax.block_until_ready((mu2, logvar2))
    mu2_ref, logvar2_ref = encode_reference(x2, raw)
    assert jnp.allclose(mu2, mu2_ref, atol=atol, rtol=rtol), \
        float(jnp.max(jnp.abs(mu2 - mu2_ref)))
    assert jnp.allclose(logvar2, logvar2_ref, atol=atol, rtol=rtol), \
        float(jnp.max(jnp.abs(logvar2 - logvar2_ref)))

    print("KERNEL_OK")
</pallas_src>

<mosaic_0001>
module attributes {stable_mosaic.version = 11 : i64} {
  func.func @encode_kernel(%arg0: i32, %arg1: memref<32x16xbf16, #tpu.memory_space<vmem>>, %arg2: memref<16x512xbf16, #tpu.memory_space<vmem>>, %arg3: memref<128x512xbf16, #tpu.memory_space<vmem>>, %arg4: memref<1x512xf32, #tpu.memory_space<vmem>>, %arg5: memref<128x256xbf16, #tpu.memory_space<vmem>>, %arg6: memref<1x256xf32, #tpu.memory_space<vmem>>, %arg7: memref<8x256xf32, #tpu.memory_space<vmem>>, %arg8: memref<8x128xf32, #tpu.memory_space<vmem>>, %arg9: memref<8x128xf32, #tpu.memory_space<vmem>>, %arg10: memref<32x512xf32, #tpu.memory_space<vmem>>) attributes {dimension_semantics = [#tpu.dimension_semantics<arbitrary>], iteration_bounds = array<i64: 2>, scalar_prefetch = 0 : i64, scratch_operands = 3 : i64, tpu.core_type = #tpu.core_type<tc>, window_params = [{transform_indices = @transform_0, window_bounds = array<i64: 32, 16>}, {pipeline_mode = #tpu.pipeline_mode<synchronous>, transform_indices = @transform_1, window_bounds = array<i64: 16, 512>}, {pipeline_mode = #tpu.pipeline_mode<synchronous>, transform_indices = @transform_2, window_bounds = array<i64: 128, 512>}, {pipeline_mode = #tpu.pipeline_mode<synchronous>, transform_indices = @transform_3, window_bounds = array<i64: 1, 512>}, {pipeline_mode = #tpu.pipeline_mode<synchronous>, transform_indices = @transform_4, window_bounds = array<i64: 128, 256>}, {pipeline_mode = #tpu.pipeline_mode<synchronous>, transform_indices = @transform_5, window_bounds = array<i64: 1, 256>}, {pipeline_mode = #tpu.pipeline_mode<synchronous>, transform_indices = @transform_6, window_bounds = array<i64: 8, 256>}]} {
    %c0_i32 = arith.constant 0 : i32
    %0 = arith.cmpi eq, %arg0, %c0_i32 : i32
    %1 = arith.extui %0 : i1 to i32
    %c0_i32_0 = arith.constant 0 : i32
    %2 = arith.cmpi ne, %1, %c0_i32_0 : i32
    scf.if %2 {
      %cst_66 = arith.constant 0.000000e+00 : f32
      %125 = vector.broadcast %cst_66 : f32 to vector<8x128xf32>
      %c0_67 = arith.constant 0 : index
      %c0_68 = arith.constant 0 : index
      %126 = vector.load %arg8[%c0_67, %c0_68] : memref<8x128xf32, #tpu.memory_space<vmem>>, vector<8x128xf32>
      tpu.vector_store %arg8[%c0_67, %c0_68], %125 {strides = array<i32>} : memref<8x128xf32, #tpu.memory_space<vmem>>, vector<8x128xf32>,
      %cst_69 = arith.constant 0.000000e+00 : f32
      %127 = vector.broadcast %cst_69 : f32 to vector<8x128xf32>
      %c0_70 = arith.constant 0 : index
      %c0_71 = arith.constant 0 : index
      %128 = vector.load %arg9[%c0_70, %c0_71] : memref<8x128xf32, #tpu.memory_space<vmem>>, vector<8x128xf32>
      tpu.vector_store %arg9[%c0_70, %c0_71], %127 {strides = array<i32>} : memref<8x128xf32, #tpu.memory_space<vmem>>, vector<8x128xf32>,
    } else {
    }
    %c0 = arith.constant 0 : index
    %c0_1 = arith.constant 0 : index
    %3 = vector.load %arg1[%c0, %c0_1] : memref<32x16xbf16, #tpu.memory_space<vmem>>, vector<32x16xbf16>
    %c0_2 = arith.constant 0 : index
    %c0_3 = arith.constant 0 : index
    %4 = vector.load %arg2[%c0_2, %c0_3] : memref<16x512xbf16, #tpu.memory_space<vmem>>, vector<16x512xbf16>
    %cst = arith.constant dense<0.000000e+00> : vector<32x512xf32>
    %5 = tpu.matmul %3, %4, %cst {dimension_numbers = #tpu.dot_dimension_numbers<[1], [0], [0], [1], [0, 0, 1, 1], [], []>} : vector<32x16xbf16>, vector<16x512xbf16>, vector<32x512xf32> -> vector<32x512xf32>
    %c0_4 = arith.constant 0 : index
    %c0_5 = arith.constant 0 : index
    %6 = vector.load %arg4[%c0_4, %c0_5] : memref<1x512xf32, #tpu.memory_space<vmem>>, vector<1x512xf32>
    %7 = vector.broadcast %6 : vector<1x512xf32> to vector<32x512xf32>
    %8 = arith.addf %5, %7 : vector<32x512xf32>
    %c0_6 = arith.constant 0 : index
    %c0_7 = arith.constant 0 : index
    %9 = vector.load %arg10[%c0_6, %c0_7] : memref<32x512xf32, #tpu.memory_space<vmem>>, vector<32x512xf32>
    tpu.vector_store %arg10[%c0_6, %c0_7], %8 {strides = array<i32>} : memref<32x512xf32, #tpu.memory_space<vmem>>, vector<32x512xf32>,
    %c0_i32_8 = arith.constant 0 : i32
    %c8_i32 = arith.constant 8 : i32
    %10 = arith.muli %c0_i32_8, %c8_i32 : i32
    %11 = tpu.assume_multiple %10, 8 : i32
    %12 = arith.index_cast %11 : i32 to index
    %c0_9 = arith.constant 0 : index
    %13 = vector.load %arg10[%12, %c0_9] : memref<32x512xf32, #tpu.memory_space<vmem>>, vector<8x512xf32>
    %c0_10 = arith.constant 0 : index
    %c0_11 = arith.constant 0 : index
    %14 = vector.load %arg8[%c0_10, %c0_11] : memref<8x128xf32, #tpu.memory_space<vmem>>, vector<8x128xf32>
    %15 = arith.truncf %14 : vector<8x128xf32> to vector<8x128xbf16>
    %c0_12 = arith.constant 0 : index
    %c0_13 = arith.constant 0 : index
    %16 = vector.load %arg3[%c0_12, %c0_13] : memref<128x512xbf16, #tpu.memory_space<vmem>>, vector<128x512xbf16>
    %cst_14 = arith.constant dense<0.000000e+00> : vector<8x512xf32>
    %17 = tpu.matmul %15, %16, %cst_14 {dimension_numbers = #tpu.dot_dimension_numbers<[1], [0], [0], [1], [0, 0, 1, 1], [], []>} : vector<8x128xbf16>, vector<128x512xbf16>, vector<8x512xf32> -> vector<8x512xf32>
    %18 = arith.addf %13, %17 : vector<8x512xf32>
    %19 = vector.extract_strided_slice %18 {offsets = [0, 0], sizes = [8, 384], strides = [1, 1]} : vector<8x512xf32> to vector<8x384xf32>
    %20 = arith.negf %19 : vector<8x384xf32>
    %21 = math.exp %20 : vector<8x384xf32>
    %cst_15 = arith.constant 1.000000e+00 : f32
    %22 = vector.broadcast %cst_15 : f32 to vector<8x384xf32>
    %23 = arith.addf %22, %21 : vector<8x384xf32>
    %24 = arith.divf %22, %23 : vector<8x384xf32>
    %25 = vector.extract_strided_slice %24 {offsets = [0, 0], sizes = [8, 128], strides = [1, 1]} : vector<8x384xf32> to vector<8x128xf32>
    %26 = vector.extract_strided_slice %24 {offsets = [0, 128], sizes = [8, 128], strides = [1, 1]} : vector<8x384xf32> to vector<8x128xf32>
    %27 = vector.extract_strided_slice %24 {offsets = [0, 256], sizes = [8, 128], strides = [1, 1]} : vector<8x384xf32> to vector<8x128xf32>
    %28 = vector.extract_strided_slice %18 {offsets = [0, 384], sizes = [8, 128], strides = [1, 1]} : vector<8x512xf32> to vector<8x128xf32>
    %29 = math.tanh %28 : vector<8x128xf32>
    %c0_16 = arith.constant 0 : index
    %c0_17 = arith.constant 0 : index
    %30 = vector.load %arg9[%c0_16, %c0_17] : memref<8x128xf32, #tpu.memory_space<vmem>>, vector<8x128xf32>
    %31 = arith.mulf %26, %30 : vector<8x128xf32>
    %32 = arith.mulf %25, %29 : vector<8x128xf32>
    %33 = arith.addf %31, %32 : vector<8x128xf32>
    %34 = math.tanh %33 : vector<8x128xf32>
    %35 = arith.mulf %27, %34 : vector<8x128xf32>
    %c0_18 = arith.constant 0 : index
    %c0_19 = arith.constant 0 : index
    %36 = vector.load %arg9[%c0_18, %c0_19] : memref<8x128xf32, #tpu.memory_space<vmem>>, vector<8x128xf32>
    tpu.vector_store %arg9[%c0_18, %c0_19], %33 {strides = array<i32>} : memref<8x128xf32, #tpu.memory_space<vmem>>, vector<8x128xf32>,
    %c0_20 = arith.constant 0 : index
    %c0_21 = arith.constant 0 : index
    %37 = vector.load %arg8[%c0_20, %c0_21] : memref<8x128xf32, #tpu.memory_space<vmem>>, vector<8x128xf32>
    tpu.vector_store %arg8[%c0_20, %c0_21], %35 {strides = array<i32>} : memref<8x128xf32, #tpu.memory_space<vmem>>, vector<8x128xf32>,
    %c1_i32 = arith.constant 1 : i32
    %c8_i32_22 = arith.constant 8 : i32
    %38 = arith.muli %c1_i32, %c8_i32_22 : i32
    %39 = tpu.assume_multiple %38, 8 : i32
    %40 = arith.index_cast %39 : i32 to index
    %c0_23 = arith.constant 0 : index
    %41 = vector.load %arg10[%40, %c0_23] : memref<32x512xf32, #tpu.memory_space<vmem>>, vector<8x512xf32>
    %c0_24 = arith.constant 0 : index
    %c0_25 = arith.constant 0 : index
    %42 = vector.load %arg8[%c0_24, %c0_25] : memref<8x128xf32, #tpu.memory_space<vmem>>, vector<8x128xf32>
    %43 = arith.truncf %42 : vector<8x128xf32> to vector<8x128xbf16>
    %c0_26 = arith.constant 0 : index
    %c0_27 = arith.constant 0 : index
    %44 = vector.load %arg3[%c0_26, %c0_27] : memref<128x512xbf16, #tpu.memory_space<vmem>>, vector<128x512xbf16>
    %cst_28 = arith.constant dense<0.000000e+00> : vector<8x512xf32>
    %45 = tpu.matmul %43, %44, %cst_28 {dimension_numbers = #tpu.dot_dimension_numbers<[1], [0], [0], [1], [0, 0, 1, 1], [], []>} : vector<8x128xbf16>, vector<128x512xbf16>, vector<8x512xf32> -> vector<8x512xf32>
    %46 = arith.addf %41, %45 : vector<8x512xf32>
    %47 = vector.extract_strided_slice %46 {offsets = [0, 0], sizes = [8, 384], strides = [1, 1]} : vector<8x512xf32> to vector<8x384xf32>
    %48 = arith.negf %47 : vector<8x384xf32>
    %49 = math.exp %48 : vector<8x384xf32>
    %cst_29 = arith.constant 1.000000e+00 : f32
    %50 = vector.broadcast %cst_29 : f32 to vector<8x384xf32>
    %51 = arith.addf %50, %49 : vector<8x384xf32>
    %52 = arith.divf %50, %51 : vector<8x384xf32>
    %53 = vector.extract_strided_slice %52 {offsets = [0, 0], sizes = [8, 128], strides = [1, 1]} : vector<8x384xf32> to vector<8x128xf32>
    %54 = vector.extract_strided_slice %52 {offsets = [0, 128], sizes = [8, 128], strides = [1, 1]} : vector<8x384xf32> to vector<8x128xf32>
    %55 = vector.extract_strided_slice %52 {offsets = [0, 256], sizes = [8, 128], strides = [1, 1]} : vector<8x384xf32> to vector<8x128xf32>
    %56 = vector.extract_strided_slice %46 {offsets = [0, 384], sizes = [8, 128], strides = [1, 1]} : vector<8x512xf32> to vector<8x128xf32>
    %57 = math.tanh %56 : vector<8x128xf32>
    %c0_30 = arith.constant 0 : index
    %c0_31 = arith.constant 0 : index
    %58 = vector.load %arg9[%c0_30, %c0_31] : memref<8x128xf32, #tpu.memory_space<vmem>>, vector<8x128xf32>
    %59 = arith.mulf %54, %58 : vector<8x128xf32>
    %60 = arith.mulf %53, %57 : vector<8x128xf32>
    %61 = arith.addf %59, %60 : vector<8x128xf32>
    %62 = math.tanh %61 : vector<8x128xf32>
    %63 = arith.mulf %55, %62 : vector<8x128xf32>
    %c0_32 = arith.constant 0 : index
    %c0_33 = arith.constant 0 : index
    %64 = vector.load %arg9[%c0_32, %c0_33] : memref<8x128xf32, #tpu.memory_space<vmem>>, vector<8x128xf32>
    tpu.vector_store %arg9[%c0_32, %c0_33], %61 {strides = array<i32>} : memref<8x128xf32, #tpu.memory_space<vmem>>, vector<8x128xf32>,
    %c0_34 = arith.constant 0 : index
    %c0_35 = arith.constant 0 : index
    %65 = vector.load %arg8[%c0_34, %c0_35] : memref<8x128xf32, #tpu.memory_space<vmem>>, vector<8x128xf32>
    tpu.vector_store %arg8[%c0_34, %c0_35], %63 {strides = array<i32>} : memref<8x128xf32, #tpu.memory_space<vmem>>, vector<8x128xf32>,
    %c2_i32 = arith.constant 2 : i32
    %c8_i32_36 = arith.constant 8 : i32
    %66 = arith.muli %c2_i32, %c8_i32_36 : i32
    %67 = tpu.assume_multiple %66, 8 : i32
    %68 = arith.index_cast %67 : i32 to index
    %c0_37 = arith.constant 0 : index
    %69 = vector.load %arg10[%68, %c0_37] : memref<32x512xf32, #tpu.memory_space<vmem>>, vector<8x512xf32>
    %c0_38 = arith.constant 0 : index
    %c0_39 = arith.constant 0 : index
    %70 = vector.load %arg8[%c0_38, %c0_39] : memref<8x128xf32, #tpu.memory_space<vmem>>, vector<8x128xf32>
    %71 = arith.truncf %70 : vector<8x128xf32> to vector<8x128xbf16>
    %c0_40 = arith.constant 0 : index
    %c0_41 = arith.constant 0 : index
    %72 = vector.load %arg3[%c0_40, %c0_41] : memref<128x512xbf16, #tpu.memory_space<vmem>>, vector<128x512xbf16>
    %cst_42 = arith.constant dense<0.000000e+00> : vector<8x512xf32>
    %73 = tpu.matmul %71, %72, %cst_42 {dimension_numbers = #tpu.dot_dimension_numbers<[1], [0], [0], [1], [0, 0, 1, 1], [], []>} : vector<8x128xbf16>, vector<128x512xbf16>, vector<8x512xf32> -> vector<8x512xf32>
    %74 = arith.addf %69, %73 : vector<8x512xf32>
    %75 = vector.extract_strided_slice %74 {offsets = [0, 0], sizes = [8, 384], strides = [1, 1]} : vector<8x512xf32> to vector<8x384xf32>
    %76 = arith.negf %75 : vector<8x384xf32>
    %77 = math.exp %76 : vector<8x384xf32>
    %cst_43 = arith.constant 1.000000e+00 : f32
    %78 = vector.broadcast %cst_43 : f32 to vector<8x384xf32>
    %79 = arith.addf %78, %77 : vector<8x384xf32>
    %80 = arith.divf %78, %79 : vector<8x384xf32>
    %81 = vector.extract_strided_slice %80 {offsets = [0, 0], sizes = [8, 128], strides = [1, 1]} : vector<8x384xf32> to vector<8x128xf32>
    %82 = vector.extract_strided_slice %80 {offsets = [0, 128], sizes = [8, 128], strides = [1, 1]} : vector<8x384xf32> to vector<8x128xf32>
    %83 = vector.extract_strided_slice %80 {offsets = [0, 256], sizes = [8, 128], strides = [1, 1]} : vector<8x384xf32> to vector<8x128xf32>
    %84 = vector.extract_strided_slice %74 {offsets = [0, 384], sizes = [8, 128], strides = [1, 1]} : vector<8x512xf32> to vector<8x128xf32>
    %85 = math.tanh %84 : vector<8x128xf32>
    %c0_44 = arith.constant 0 : index
    %c0_45 = arith.constant 0 : index
    %86 = vector.load %arg9[%c0_44, %c0_45] : memref<8x128xf32, #tpu.memory_space<vmem>>, vector<8x128xf32>
    %87 = arith.mulf %82, %86 : vector<8x128xf32>
    %88 = arith.mulf %81, %85 : vector<8x128xf32>
    %89 = arith.addf %87, %88 : vector<8x128xf32>
    %90 = math.tanh %89 : vector<8x128xf32>
    %91 = arith.mulf %83, %90 : vector<8x128xf32>
    %c0_46 = arith.constant 0 : index
    %c0_47 = arith.constant 0 : index
    %92 = vector.load %arg9[%c0_46, %c0_47] : memref<8x128xf32, #tpu.memory_space<vmem>>, vector<8x128xf32>
    tpu.vector_store %arg9[%c0_46, %c0_47], %89 {strides = array<i32>} : memref<8x128xf32, #tpu.memory_space<vmem>>, vector<8x128xf32>,
    %c0_48 = arith.constant 0 : index
    %c0_49 = arith.constant 0 : index
    %93 = vector.load %arg8[%c0_48, %c0_49] : memref<8x128xf32, #tpu.memory_space<vmem>>, vector<8x128xf32>
    tpu.vector_store %arg8[%c0_48, %c0_49], %91 {strides = array<i32>} : memref<8x128xf32, #tpu.memory_space<vmem>>, vector<8x128xf32>,
    %c3_i32 = arith.constant 3 : i32
    %c8_i32_50 = arith.constant 8 : i32
    %94 = arith.muli %c3_i32, %c8_i32_50 : i32
    %95 = tpu.assume_multiple %94, 8 : i32
    %96 = arith.index_cast %95 : i32 to index
    %c0_51 = arith.constant 0 : index
    %97 = vector.load %arg10[%96, %c0_51] : memref<32x512xf32, #tpu.memory_space<vmem>>, vector<8x512xf32>
    %c0_52 = arith.constant 0 : index
    %c0_53 = arith.constant 0 : index
    %98 = vector.load %arg8[%c0_52, %c0_53] : memref<8x128xf32, #tpu.memory_space<vmem>>, vector<8x128xf32>
    %99 = arith.truncf %98 : vector<8x128xf32> to vector<8x128xbf16>
    %c0_54 = arith.constant 0 : index
    %c0_55 = arith.constant 0 : index
    %100 = vector.load %arg3[%c0_54, %c0_55] : memref<128x512xbf16, #tpu.memory_space<vmem>>, vector<128x512xbf16>
    %cst_56 = arith.constant dense<0.000000e+00> : vector<8x512xf32>
    %101 = tpu.matmul %99, %100, %cst_56 {dimension_numbers = #tpu.dot_dimension_numbers<[1], [0], [0], [1], [0, 0, 1, 1], [], []>} : vector<8x128xbf16>, vector<128x512xbf16>, vector<8x512xf32> -> vector<8x512xf32>
    %102 = arith.addf %97, %101 : vector<8x512xf32>
    %103 = vector.extract_strided_slice %102 {offsets = [0, 0], sizes = [8, 384], strides = [1, 1]} : vector<8x512xf32> to vector<8x384xf32>
    %104 = arith.negf %103 : vector<8x384xf32>
    %105 = math.exp %104 : vector<8x384xf32>
    %cst_57 = arith.constant 1.000000e+00 : f32
    %106 = vector.broadcast %cst_57 : f32 to vector<8x384xf32>
    %107 = arith.addf %106, %105 : vector<8x384xf32>
    %108 = arith.divf %106, %107 : vector<8x384xf32>
    %109 = vector.extract_strided_slice %108 {offsets = [0, 0], sizes = [8, 128], strides = [1, 1]} : vector<8x384xf32> to vector<8x128xf32>
    %110 = vector.extract_strided_slice %108 {offsets = [0, 128], sizes = [8, 128], strides = [1, 1]} : vector<8x384xf32> to vector<8x128xf32>
    %111 = vector.extract_strided_slice %108 {offsets = [0, 256], sizes = [8, 128], strides = [1, 1]} : vector<8x384xf32> to vector<8x128xf32>
    %112 = vector.extract_strided_slice %102 {offsets = [0, 384], sizes = [8, 128], strides = [1, 1]} : vector<8x512xf32> to vector<8x128xf32>
    %113 = math.tanh %112 : vector<8x128xf32>
    %c0_58 = arith.constant 0 : index
    %c0_59 = arith.constant 0 : index
    %114 = vector.load %arg9[%c0_58, %c0_59] : memref<8x128xf32, #tpu.memory_space<vmem>>, vector<8x128xf32>
    %115 = arith.mulf %110, %114 : vector<8x128xf32>
    %116 = arith.mulf %109, %113 : vector<8x128xf32>
    %117 = arith.addf %115, %116 : vector<8x128xf32>
    %118 = math.tanh %117 : vector<8x128xf32>
    %119 = arith.mulf %111, %118 : vector<8x128xf32>
    %c0_60 = arith.constant 0 : index
    %c0_61 = arith.constant 0 : index
    %120 = vector.load %arg9[%c0_60, %c0_61] : memref<8x128xf32, #tpu.memory_space<vmem>>, vector<8x128xf32>
    tpu.vector_store %arg9[%c0_60, %c0_61], %117 {strides = array<i32>} : memref<8x128xf32, #tpu.memory_space<vmem>>, vector<8x128xf32>,
    %c0_62 = arith.constant 0 : index
    %c0_63 = arith.constant 0 : index
    %121 = vector.load %arg8[%c0_62, %c0_63] : memref<8x128xf32, #tpu.memory_space<vmem>>, vector<8x128xf32>
    tpu.vector_store %arg8[%c0_62, %c0_63], %119 {strides = array<i32>} : memref<8x128xf32, #tpu.memory_space<vmem>>, vector<8x128xf32>,
    %c4_i32 = arith.constant 4 : i32
    %c1_i32_64 = arith.constant 1 : i32
    %122 = arith.cmpi eq, %arg0, %c1_i32_64 : i32
    %123 = arith.extui %122 : i1 to i32
    %c0_i32_65 = arith.constant 0 : i32
    %124 = arith.cmpi ne, %123, %c0_i32_65 : i32
    scf.if %124 {
      %c0_66 = arith.constant 0 : index
      %c0_67 = arith.constant 0 : index
      %125 = vector.load %arg8[%c0_66, %c0_67] : memref<8x128xf32, #tpu.memory_space<vmem>>, vector<8x128xf32>
      %126 = arith.truncf %125 : vector<8x128xf32> to vector<8x128xbf16>
      %c0_68 = arith.constant 0 : index
      %c0_69 = arith.constant 0 : index
      %127 = vector.load %arg5[%c0_68, %c0_69] : memref<128x256xbf16, #tpu.memory_space<vmem>>, vector<128x256xbf16>
      %cst_70 = arith.constant dense<0.000000e+00> : vector<8x256xf32>
      %128 = tpu.matmul %126, %127, %cst_70 {dimension_numbers = #tpu.dot_dimension_numbers<[1], [0], [0], [1], [0, 0, 1, 1], [], []>} : vector<8x128xbf16>, vector<128x256xbf16>, vector<8x256xf32> -> vector<8x256xf32>
      %c0_71 = arith.constant 0 : index
      %c0_72 = arith.constant 0 : index
      %129 = vector.load %arg6[%c0_71, %c0_72] : memref<1x256xf32, #tpu.memory_space<vmem>>, vector<1x256xf32>
      %130 = vector.broadcast %129 : vector<1x256xf32> to vector<8x256xf32>
      %131 = arith.addf %128, %130 : vector<8x256xf32>
      %c0_73 = arith.constant 0 : index
      %c0_74 = arith.constant 0 : index
      %132 = vector.load %arg7[%c0_73, %c0_74] : memref<8x256xf32, #tpu.memory_space<vmem>>, vector<8x256xf32>
      tpu.vector_store %arg7[%c0_73, %c0_74], %131 {strides = array<i32>} : memref<8x256xf32, #tpu.memory_space<vmem>>, vector<8x256xf32>,
    } else {
    }
    return
  }
  func.func @transform_0(%arg0: i32) -> (i32, i32) {
    %c0_i32 = arith.constant 0 : i32
    %c0_i32_0 = arith.constant 0 : i32
    return %arg0, %c0_i32 : i32, i32
  }
  func.func @transform_1(%arg0: i32) -> (i32, i32) {
    %c0_i32 = arith.constant 0 : i32
    %c0_i32_0 = arith.constant 0 : i32
    %c0_i32_1 = arith.constant 0 : i32
    return %c0_i32, %c0_i32_0 : i32, i32
  }
  func.func @transform_2(%arg0: i32) -> (i32, i32) {
    %c0_i32 = arith.constant 0 : i32
    %c0_i32_0 = arith.constant 0 : i32
    %c0_i32_1 = arith.constant 0 : i32
    return %c0_i32, %c0_i32_0 : i32, i32
  }
  func.func @transform_3(%arg0: i32) -> (i32, i32) {
    %c0_i32 = arith.constant 0 : i32
    %c0_i32_0 = arith.constant 0 : i32
    %c0_i32_1 = arith.constant 0 : i32
    return %c0_i32, %c0_i32_0 : i32, i32
  }
  func.func @transform_4(%arg0: i32) -> (i32, i32) {
    %c0_i32 = arith.constant 0 : i32
    %c0_i32_0 = arith.constant 0 : i32
    %c0_i32_1 = arith.constant 0 : i32
    return %c0_i32, %c0_i32_0 : i32, i32
  }
  func.func @transform_5(%arg0: i32) -> (i32, i32) {
    %c0_i32 = arith.constant 0 : i32
    %c0_i32_0 = arith.constant 0 : i32
    %c0_i32_1 = arith.constant 0 : i32
    return %c0_i32, %c0_i32_0 : i32, i32
  }
  func.func @transform_6(%arg0: i32) -> (i32, i32) {
    %c0_i32 = arith.constant 0 : i32
    %c0_i32_0 = arith.constant 0 : i32
    %c0_i32_1 = arith.constant 0 : i32
    return %c0_i32, %c0_i32_0 : i32, i32
  }
}

</mosaic_0001>

<bundles_post_ra>
// kernel: tpu_custom_call.1
= control target key start
LH: loop header
LB: loop body
LE: loop exit
PB: predicated region body
PF: predicated region fallthrough
CT: control target
= control target key end

     0   :  { %11 = vsyncpa [#allocation6], 0  ;;  %s3147_s0 = inlined_call_operand.vmem [shape: bf16[64,16], index: 0, kind: input, shape index: {}]   ;;  %s3148_s1 = inlined_call_operand.vmem [shape: bf16[16,512], index: 1, kind: input, shape index: {}]   ;;  %s3149_s2 = inlined_call_operand.hbm [shape: bf16[128,512], index: 2, kind: input, shape index: {}]   ;;  %s3150_s3 = inlined_call_operand.vmem [shape: f32[1,512], index: 3, kind: input, shape index: {}]   ;;  %s3151_s4 = inlined_call_operand.hbm [shape: bf16[128,256], index: 4, kind: input, shape index: {}]   ;;  %s3152_s5 = inlined_call_operand.vmem [shape: f32[1,256], index: 5, kind: input, shape index: {}]   ;;  %s3153_s6 = inlined_call_operand.hbm [shape: f32[8,256], index: 6, kind: output, shape index: {}]  }
   0x1   :  { %12 = vsyncpa [#allocation9], 0 }
   0x2   :  { %13 = vsyncpa [#allocation7], 0  ;;  %s2971_s21 = smov 0  }
   0x3 LB: > { %s190_s24 = sshll.u32 %s3149_s2, 4  ;;  %s2980_s25 = sadd.s32 4294967295, %s2926_s21   ;;  %s2926_s21 = sphi %s2971_s21, %s19_s21   ;;  %s191_s24 = int_to_ptr.hbm [resolvable:$true] %s190_s24 }
   0x4   : > { %p1930_p0 = scmp.ge.s32.totalorder %s2926_s21, 1  ;;  %p176_p1 = scmp.lt.s32.totalorder %s2926_s21, 3 }
   0x5   : > { %p1931_p2 = scmp.ne.s32.totalorder %s2980_s25, 0  ;;  %p2734_p3 = scmp.eq.s32.totalorder %s2980_s25, 0 }
   0x6   : > { %p2986_p4 = pnand %p1930_p0, %p176_p1  ;;  %s2928_s27 = smov [#allocation5]  }
   0x7   : > { %s192_s28 = sshll.u32 %s2928_s27, 4  ;;  %s207_s7 = sshll.u32 %s3151_s4, 4  ;;  %s193_s28 = int_to_ptr.vmem [resolvable:$true] %s192_s28  ;;  %s208_s7 = int_to_ptr.hbm [resolvable:$true] %s207_s7 }
   0x8   : > { %p2727_p5 = pneg %p2986_p4  ;;  %s2929_s8 = smov [#allocation8]  }
   0x9   : > { %s209_s9 = sshll.u32 %s2929_s8, 4  ;;  %s2930_s10 = smov 256   ;;  %s210_s9 = int_to_ptr.vmem [resolvable:$true] %s209_s9 }
   0xa   : > { %p2728_p6 = pnand %p2734_p3, %p2727_p5  ;;  %s2931_s11 = smov 16  }
   0xb   : > { %s2932_s12 = smov 128   ;;  %s2933_s13 = smov 8  }
   0xc   : > { %2730 = dma.hbm_to_vmem [thread:$0]  (!%p2728_p6), %s191_s24, 4096, %s193_s28, [#allocation6], %s2930_s10, %s2930_s10, %s2931_s11  }
   0xd   : > { %2733 = dma.hbm_to_vmem [thread:$0]  (!%p2728_p6), %s208_s7, 2048, %s210_s9, [#allocation9], %s2932_s12, %s2932_s12, %s2933_s13  }
   0xe   : > { %237 = sbr.rel (%p2986_p4) target bundleno = 931 (0x3a3), region = 44 }
  0x13   : > { %2913 = dma.done.wait (%p2734_p3), [#allocation6], 4096  }
  0x14   : > { %2915 = vsyncadd (%p2734_p3), [#allocation6], 4294963200 }
  0x15   : > { %2917 = dma.done.wait (%p2734_p3), [#allocation9], 2048  }
  0x16   : > { %2919 = vsyncadd (%p2734_p3), [#allocation9], 4294965248  ;;  %s1937_s14 = sshll.u32 %s2980_s25, 2 }
  0x17   : > { %p269_p7 = scmp.lt.s32.totalorder %s1937_s14, 7  ;;  %278 = sbr.rel (%p1931_p2) target bundleno = 31 (0x1f), region = 56 }
  0x19   : > { %s3156_s14 = smov (!%p269_p7, %s1937_s14), 7 }
  0x1a   : > { %s1938_s15 = sshll.u32 %s3156_s14, 2 }
  0x1b   : > { %s3011_s18 = scalar_lea.vmem %s3147_s0, %s1938_s15 }
  0x1c   : > { %v2934_v0 = vmov 0.0  }
  0x1d   : > { %279 = vst [vmem:[#allocation2] sm:$0xff] %v2934_v0 }
  0x1e   : > { %280 = vst [vmem:[#allocation3] sm:$0xff] %v2934_v0 }
  0x1f PF: > { %v1950_v1 = vld [vmem:[%s3148_s1] sm:$0xf]  ;;  %v2569_v2 = vld [vmem:[%s3148_s1 + $0xc] sm:$0xf0]  ;;  %v2567_v3 = vld [vmem:[%s3148_s1 + $0x4] sm:$0xf] }
  0x20   : > { %v1951_v4 = vor.u32 %v2569_v2, %v1950_v1  ;;  %v1952_v5 = vld [vmem:[%s3148_s1 + $0x10] sm:$0xf0]  ;;  %v1958_v6 = vld [vmem:[%s3148_s1 + $0x8] sm:$0xf]  ;;  %v2570_v7 = vld [vmem:[%s3148_s1 + $0x14] sm:$0xf0] }
  0x21   : > { %v1955_v8 = vor.u32 %v2567_v3, %v1952_v5  ;;  %v1959_v9 = vor.u32 %v2570_v7, %v1958_v6  ;;  %v2568_v10 = vld [vmem:[%s3148_s1 + $0xc] sm:$0xf]  ;;  %v1960_v11 = vld [vmem:[%s3148_s1 + $0x18] sm:$0xf0]  ;;  %v2565_v12 = vld [vmem:[%s3011_s18] sm:$0xff]  ;;  %vm329_vm0 = vcmask 130048  }
  0x22   : > { %343 = vmatpush.bf16.msra.mxu0 %v1951_v4  ;;  %v1963_v13 = vor.u32 %v2568_v10, %v1960_v11  ;;  %v2086_v14 = vld [vmem:[#allocation5 + $0xe0] sm:$0xf]  ;;  %v2601_v15 = vld [vmem:[#allocation5 + $0xec] sm:$0xf0]  ;;  %v2599_v16 = vld [vmem:[#allocation5 + $0xe4] sm:$0xf] }
  0x23   : > { %362 = vmatpush.bf16.msra.mxu1 %v1955_v8  ;;  %381 = vmatpush.bf16.msra.mxu2 %v1959_v9  ;;  %v2087_v17 = vor.u32 %v2601_v15, %v2086_v14  ;;  %v2088_v18 = vld [vmem:[#allocation5 + $0xf0] sm:$0xf0]  ;;  %v2094_v19 = vld [vmem:[#allocation5 + $0xe8] sm:$0xf]  ;;  %v2602_v20 = vld [vmem:[#allocation5 + $0xf4] sm:$0xf0] }
  0x24   : > { %400 = vmatpush.bf16.msra.mxu3 %v1963_v13  ;;  %v2091_v21 = vor.u32 %v2599_v16, %v2088_v18  ;;  %v2095_v22 = vor.u32 %v2602_v20, %v2094_v19  ;;  %v2600_v23 = vld [vmem:[#allocation5 + $0xec] sm:$0xf]  ;;  %v2096_v24 = vld [vmem:[#allocation5 + $0xf8] sm:$0xf0]  ;;  %v2070_v25 = vld [vmem:[#allocation5 + $0xc0] sm:$0xf] }
  0x25   : > { %1964 = vmatmul.msk.bf16.vlgmr.msra.gmra.mxu0 %vm329_vm0, %v2565_v12  ;;  %v2099_v26 = vor.u32 %v2600_v23, %v2096_v24  ;;  %v2597_v27 = vld [vmem:[#allocation5 + $0xcc] sm:$0xf0]  ;;  %v2595_v28 = vld [vmem:[#allocation5 + $0xc4] sm:$0xf]  ;;  %v2072_v29 = vld [vmem:[#allocation5 + $0xd0] sm:$0xf0] }
  0x26   : > { %1966 = vmatmul.msk.bf16.vlgmr.msra.gmra.mxu1 %vm329_vm0, %v2565_v12  ;;  %1968 = vmatmul.msk.bf16.vlgmr.msra.gmra.mxu2 %vm329_vm0, %v2565_v12  ;;  %v2078_v30 = vld [vmem:[#allocation5 + $0xc8] sm:$0xf]  ;;  %v2598_v31 = vld [vmem:[#allocation5 + $0xd4] sm:$0xf0]  ;;  %v2596_v32 = vld [vmem:[#allocation5 + $0xcc] sm:$0xf]  ;;  %v2071_v33 = vor.u32 %v2597_v27, %v2070_v25  ;;  %v2075_v35 = vor.u32 %v2595_v28, %v2072_v29 }
  0x27   : > { %1970 = vmatmul.msk.bf16.vlgmr.msra.gmra.mxu3 %vm329_vm0, %v2565_v12  ;;  %629 = vmatpush.bf16.msrb.mxu0 %v2087_v17  ;;  %v2080_v34 = vld [vmem:[#allocation5 + $0xd8] sm:$0xf0]  ;;  %v2079_v36 = vor.u32 %v2598_v31, %v2078_v30  ;;  %v2054_v37 = vld [vmem:[#allocation5 + $0xa0] sm:$0xf]  ;;  %v2593_v38 = vld [vmem:[#allocation5 + $0xac] sm:$0xf0] }
  0x28   : > { %642 = vmatpush.bf16.msrb.mxu1 %v2091_v21  ;;  %655 = vmatpush.bf16.msrb.mxu2 %v2095_v22  ;;  %v2591_v39 = vld [vmem:[#allocation5 + $0xa4] sm:$0xf]  ;;  %v2083_v40 = vor.u32 %v2596_v32, %v2080_v34  ;;  %v2056_v41 = vld [vmem:[#allocation5 + $0xb0] sm:$0xf0]  ;;  %v2062_v42 = vld [vmem:[#allocation5 + $0xa8] sm:$0xf]  ;;  %v2055_v46 = vor.u32 %v2593_v38, %v2054_v37 }
  0x29   : > { %668 = vmatpush.bf16.msrb.mxu3 %v2099_v26  ;;  %v2594_v43 = vld [vmem:[#allocation5 + $0xb4] sm:$0xf0]  ;;  %v2592_v44 = vld [vmem:[#allocation5 + $0xac] sm:$0xf]  ;;  %v2064_v45 = vld [vmem:[#allocation5 + $0xb8] sm:$0xf0]  ;;  %v2059_v47 = vor.u32 %v2591_v39, %v2056_v41 }
  0x2a   : > { %v2063_v48 = vor.u32 %v2594_v43, %v2062_v42  ;;  %v2038_v49 = vld [vmem:[#allocation5 + $0x80] sm:$0xf]  ;;  %v2589_v50 = vld [vmem:[#allocation5 + $0x8c] sm:$0xf0]  ;;  %v2587_v51 = vld [vmem:[#allocation5 + $0x84] sm:$0xf]  ;;  %v2067_v52 = vor.u32 %v2592_v44, %v2064_v45 }
  0x2b   : > { %630 = vmatpush.bf16.msrb.mxu0 %v2071_v33  ;;  %v2040_v53 = vld [vmem:[#allocation5 + $0x90] sm:$0xf0]  ;;  %v2046_v54 = vld [vmem:[#allocation5 + $0x88] sm:$0xf]  ;;  %v2590_v55 = vld [vmem:[#allocation5 + $0x94] sm:$0xf0]  ;;  %v2039_v58 = vor.u32 %v2589_v50, %v2038_v49 }
  0x2c   : > { %643 = vmatpush.bf16.msrb.mxu1 %v2075_v35  ;;  %656 = vmatpush.bf16.msrb.mxu2 %v2079_v36  ;;  %v2588_v56 = vld [vmem:[#allocation5 + $0x8c] sm:$0xf]  ;;  %v2048_v57 = vld [vmem:[#allocation5 + $0x98] sm:$0xf0]  ;;  %v2043_v60 = vor.u32 %v2587_v51, %v2040_v53  ;;  %v2047_v61 = vor.u32 %v2590_v55, %v2046_v54  ;;  %v2022_v62 = vld [vmem:[#allocation5 + $0x60] sm:$0xf] }
  0x2d   : > { %669 = vmatpush.bf16.msrb.mxu3 %v2083_v40  ;;  %v2566_v59 = vld [vmem:[%s3011_s18 + $0x8] sm:$0xff]  ;;  %v2585_v63 = vld [vmem:[#allocation5 + $0x6c] sm:$0xf0]  ;;  %v2583_v0 = vld [vmem:[#allocation5 + $0x64] sm:$0xf]  ;;  %v2051_v1 = vor.u32 %v2588_v56, %v2048_v57  ;;  %p2496_p8 = scmp.ne.s32.totalorder %s2980_s25, 1 }
  0x2e   : > { %v2024_v2 = vld [vmem:[#allocation5 + $0x70] sm:$0xf0]  ;;  %v2030_v3 = vld [vmem:[#allocation5 + $0x68] sm:$0xf]  ;;  %v2586_v4 = vld [vmem:[#allocation5 + $0x74] sm:$0xf0]  ;;  %v2023_v7 = vor.u32 %v2585_v63, %v2022_v62 }
  0x2f   : > { %631 = vmatpush.bf16.msrb.mxu0 %v2055_v46  ;;  %v2584_v5 = vld [vmem:[#allocation5 + $0x6c] sm:$0xf]  ;;  %v2032_v6 = vld [vmem:[#allocation5 + $0x78] sm:$0xf0]  ;;  %v2027_v8 = vor.u32 %v2583_v0, %v2024_v2  ;;  %v2031_v9 = vor.u32 %v2586_v4, %v2030_v3  ;;  %v2006_v10 = vld [vmem:[#allocation5 + $0x40] sm:$0xf] }
  0x30   : > { %644 = vmatpush.bf16.msrb.mxu1 %v2059_v47  ;;  %657 = vmatpush.bf16.msrb.mxu2 %v2063_v48  ;;  %v2581_v11 = vld [vmem:[#allocation5 + $0x4c] sm:$0xf0]  ;;  %v2579_v12 = vld [vmem:[#allocation5 + $0x44] sm:$0xf]  ;;  %v2035_v13 = vor.u32 %v2584_v5, %v2032_v6  ;;  %v2008_v14 = vld [vmem:[#allocation5 + $0x50] sm:$0xf0] }
  0x31   : > { %670 = vmatpush.bf16.msrb.mxu3 %v2067_v52  ;;  %v2014_v15 = vld [vmem:[#allocation5 + $0x48] sm:$0xf]  ;;  %v2582_v16 = vld [vmem:[#allocation5 + $0x54] sm:$0xf0]  ;;  %v2580_v17 = vld [vmem:[#allocation5 + $0x4c] sm:$0xf]  ;;  %v2007_v19 = vor.u32 %v2581_v11, %v2006_v10  ;;  %v2011_v20 = vor.u32 %v2579_v12, %v2008_v14 }
  0x32   : > { %v2016_v18 = vld [vmem:[#allocation5 + $0x58] sm:$0xf0]  ;;  %v2015_v21 = vor.u32 %v2582_v16, %v2014_v15  ;;  %v1990_v22 = vld [vmem:[#allocation5 + $0x20] sm:$0xf]  ;;  %v2577_v23 = vld [vmem:[#allocation5 + $0x2c] sm:$0xf0] }
  0x33   : > { %632 = vmatpush.bf16.msrb.mxu0 %v2039_v58  ;;  %v2575_v24 = vld [vmem:[#allocation5 + $0x24] sm:$0xf]  ;;  %v2019_v25 = vor.u32 %v2580_v17, %v2016_v18  ;;  %v1992_v26 = vld [vmem:[#allocation5 + $0x30] sm:$0xf0]  ;;  %v1998_v27 = vld [vmem:[#allocation5 + $0x28] sm:$0xf]  ;;  %v1991_v31 = vor.u32 %v2577_v23, %v1990_v22 }
  0x34   : > { %645 = vmatpush.bf16.msrb.mxu1 %v2043_v60  ;;  %658 = vmatpush.bf16.msrb.mxu2 %v2047_v61  ;;  %v2578_v28 = vld [vmem:[#allocation5 + $0x34] sm:$0xf0]  ;;  %v2576_v29 = vld [vmem:[#allocation5 + $0x2c] sm:$0xf]  ;;  %v2000_v30 = vld [vmem:[#allocation5 + $0x38] sm:$0xf0]  ;;  %v1995_v32 = vor.u32 %v2575_v24, %v1992_v26 }
  0x35   : > { %671 = vmatpush.bf16.msrb.mxu3 %v2051_v1  ;;  %1965 = vmatmul.msk.bf16.gmra.mxu0 %vm329_vm0, %v2566_v59  ;;  %v1999_v33 = vor.u32 %v2578_v28, %v1998_v27  ;;  %v1974_v34 = vld [vmem:[#allocation5] sm:$0xf]  ;;  %v2573_v35 = vld [vmem:[#allocation5 + $0xc] sm:$0xf0]  ;;  %v2571_v36 = vld [vmem:[#allocation5 + $0x4] sm:$0xf]  ;;  %v2003_v37 = vor.u32 %v2576_v29, %v2000_v30 }
  0x36   : > { %1967 = vmatmul.msk.bf16.gmra.mxu1 %vm329_vm0, %v2566_v59  ;;  %1969 = vmatmul.msk.bf16.gmra.mxu2 %vm329_vm0, %v2566_v59  ;;  %v1976_v38 = vld [vmem:[#allocation5 + $0x10] sm:$0xf0]  ;;  %v1982_v39 = vld [vmem:[#allocation5 + $0x8] sm:$0xf]  ;;  %v2574_v40 = vld [vmem:[#allocation5 + $0x14] sm:$0xf0]  ;;  %v1975_v43 = vor.u32 %v2573_v35, %v1974_v34 }
  0x37   : > { %1971 = vmatmul.msk.bf16.gmra.mxu3 %vm329_vm0, %v2566_v59  ;;  %633 = vmatpush.bf16.msrb.mxu0 %v2023_v7  ;;  %v2572_v41 = vld [vmem:[#allocation5 + $0xc] sm:$0xf]  ;;  %v1984_v42 = vld [vmem:[#allocation5 + $0x18] sm:$0xf0]  ;;  %v435_v44 = vld [vmem:[#allocation2] sm:$0xff]  ;;  %v1979_v45 = vor.u32 %v2571_v36, %v1976_v38  ;;  %v1983_v46 = vor.u32 %v2574_v40, %v1982_v39 }
  0x38   : > { %646 = vmatpush.bf16.msrb.mxu1 %v2027_v8  ;;  %659 = vmatpush.bf16.msrb.mxu2 %v2031_v9  ;;  %v1987_v47 = vor.u32 %v2572_v41, %v1984_v42  ;;  %v436_v48 = vpack.c.bf16 %v435_v44, %v435_v44  ;;  %v289_v51 = vld [vmem:[%s3150_s3] sm:$0xf]  ;;  %v2217_v63 = vld [vmem:[#allocation5 + $0xe0] sm:$0xf]  ;;  %v2631_v1 = vld [vmem:[#allocation5 + $0xe4] sm:$0xf] }
  0x39   : > { %672 = vmatpush.bf16.msrb.mxu3 %v2035_v13  ;;  %v3056_v52 = vperm.slane %v289_v51, 0  ;;  %v3060_v54 = vperm.slane %v289_v51, 1  ;;  %v3070_v60 = vperm.slane %v289_v51, 3  ;;  %v3072_v61 = vperm.slane %v289_v51, 2  ;;  %v2633_v0 = vld [vmem:[#allocation5 + $0xec] sm:$0xf0] }
  0x3a   : > { %v2218_v5 = vor.u32 %v2633_v0, %v2217_v63  ;;  %v2219_v6 = vld [vmem:[#allocation5 + $0xf0] sm:$0xf0]  ;;  %v2225_v7 = vld [vmem:[#allocation5 + $0xe8] sm:$0xf]  ;;  %v2634_v8 = vld [vmem:[#allocation5 + $0xf4] sm:$0xf0] }
  0x3b   : > { %634 = vmatpush.bf16.msrb.mxu0 %v2007_v19  ;;  %v2222_v12 = vor.u32 %v2631_v1, %v2219_v6  ;;  %v2226_v13 = vor.u32 %v2634_v8, %v2225_v7  ;;  %v2632_v14 = vld [vmem:[#allocation5 + $0xec] sm:$0xf]  ;;  %v2227_v15 = vld [vmem:[#allocation5 + $0xf8] sm:$0xf0]  ;;  %v2201_v18 = vld [vmem:[#allocation5 + $0xc0] sm:$0xf] }
  0x3c   : > { %647 = vmatpush.bf16.msrb.mxu1 %v2011_v20  ;;  %660 = vmatpush.bf16.msrb.mxu2 %v2015_v21  ;;  %v2230_v17 = vor.u32 %v2632_v14, %v2227_v15  ;;  %v2629_v19 = vld [vmem:[#allocation5 + $0xcc] sm:$0xf0]  ;;  %v2627_v20 = vld [vmem:[#allocation5 + $0xc4] sm:$0xf]  ;;  %v2203_v22 = vld [vmem:[#allocation5 + $0xd0] sm:$0xf0] }
  0x3d   : > { %673 = vmatpush.bf16.msrb.mxu3 %v2019_v25  ;;  %v2202_v21 = vor.u32 %v2629_v19, %v2201_v18  ;;  %v2209_v23 = vld [vmem:[#allocation5 + $0xc8] sm:$0xf]  ;;  %v2630_v24 = vld [vmem:[#allocation5 + $0xd4] sm:$0xf0]  ;;  %v2206_v25 = vor.u32 %v2627_v20, %v2203_v22  ;;  %v2628_v27 = vld [vmem:[#allocation5 + $0xcc] sm:$0xf] }
  0x3e   : > { %v2210_v26 = vor.u32 %v2630_v24, %v2209_v23  ;;  %v2211_v28 = vld [vmem:[#allocation5 + $0xd8] sm:$0xf0]  ;;  %v2187_v38 = vld [vmem:[#allocation5 + $0xb0] sm:$0xf0]  ;;  %v2193_v39 = vld [vmem:[#allocation5 + $0xa8] sm:$0xf] }
  0x3f   : > { %635 = vmatpush.bf16.msrb.mxu0 %v1991_v31  ;;  %v2214_v29 = vor.u32 %v2628_v27, %v2211_v28  ;;  %v2185_v31 = vld [vmem:[#allocation5 + $0xa0] sm:$0xf]  ;;  %v2626_v40 = vld [vmem:[#allocation5 + $0xb4] sm:$0xf0]  ;;  %v2171_v0 = vld [vmem:[#allocation5 + $0x90] sm:$0xf0] }
  0x40   : > { %648 = vmatpush.bf16.msrb.mxu1 %v1995_v32  ;;  %661 = vmatpush.bf16.msrb.mxu2 %v1999_v33  ;;  %v2625_v32 = vld [vmem:[#allocation5 + $0xac] sm:$0xf0]  ;;  %v2623_v33 = vld [vmem:[#allocation5 + $0xa4] sm:$0xf]  ;;  %v2177_v1 = vld [vmem:[#allocation5 + $0x88] sm:$0xf] }
  0x41   : > { %674 = vmatpush.bf16.msrb.mxu3 %v2003_v37  ;;  %v2186_v37 = vor.u32 %v2625_v32, %v2185_v31  ;;  %v2190_v44 = vor.u32 %v2623_v33, %v2187_v38  ;;  %v2620_v6 = vld [vmem:[#allocation5 + $0x8c] sm:$0xf]  ;;  %v2179_v7 = vld [vmem:[#allocation5 + $0x98] sm:$0xf0]  ;;  %v2615_v14 = vld [vmem:[#allocation5 + $0x64] sm:$0xf] }
  0x42   : > { %v2182_v8 = vor.u32 %v2620_v6, %v2179_v7  ;;  %v2155_v20 = vld [vmem:[#allocation5 + $0x70] sm:$0xf0]  ;;  %v2618_v22 = vld [vmem:[#allocation5 + $0x74] sm:$0xf0]  ;;  %v2616_v28 = vld [vmem:[#allocation5 + $0x6c] sm:$0xf] }
  0x43   : > { %636 = vmatpush.bf16.msrb.mxu0 %v1975_v43  ;;  %v2137_v32 = vld [vmem:[#allocation5 + $0x40] sm:$0xf]  ;;  %v2613_v33 = vld [vmem:[#allocation5 + $0x4c] sm:$0xf0] }
  0x44   : > { %649 = vmatpush.bf16.msrb.mxu1 %v1979_v45  ;;  %662 = vmatpush.bf16.msrb.mxu2 %v1983_v46  ;;  %v2194_v45 = vor.u32 %v2626_v40, %v2193_v39  ;;  %v2624_v46 = vld [vmem:[#allocation5 + $0xac] sm:$0xf]  ;;  %v2614_v40 = vld [vmem:[#allocation5 + $0x54] sm:$0xf0] }
  0x45   : > { %675 = vmatpush.bf16.msrb.mxu3 %v1987_v47  ;;  %v2195_v47 = vld [vmem:[#allocation5 + $0xb8] sm:$0xf0] }
  0x46   : > { %637 = vmatmul.bf16.vlgmr.msrb.gmra.mxu0 %v436_v48  ;;  %v2198_v51 = vor.u32 %v2624_v46, %v2195_v47 }
  0x47   : > { %650 = vmatmul.bf16.vlgmr.msrb.gmra.mxu1 %v436_v48  ;;  %663 = vmatmul.bf16.vlgmr.msrb.gmra.mxu2 %v436_v48 }
  0x48   : > { %676 = vmatmul.bf16.vlgmr.msrb.gmra.mxu3 %v436_v48  ;;  %952 = vmatpush.bf16.msra.mxu0 %v2218_v5 }
  0x49   : > { %965 = vmatpush.bf16.msra.mxu1 %v2222_v12  ;;  %978 = vmatpush.bf16.msra.mxu2 %v2226_v13  ;;  %v2153_v12 = vld [vmem:[#allocation5 + $0x60] sm:$0xf]  ;;  %v2617_v13 = vld [vmem:[#allocation5 + $0x6c] sm:$0xf0] }
  0x4a   : > { %991 = vmatpush.bf16.msra.mxu3 %v2230_v17  ;;  %v2154_v19 = vor.u32 %v2617_v13, %v2153_v12 }
  0x4c   : > { %953 = vmatpush.bf16.msra.mxu0 %v2202_v21  ;;  %v2161_v21 = vld [vmem:[#allocation5 + $0x68] sm:$0xf] }
  0x4d   : > { %966 = vmatpush.bf16.msra.mxu1 %v2206_v25  ;;  %979 = vmatpush.bf16.msra.mxu2 %v2210_v26  ;;  %v2158_v26 = vor.u32 %v2615_v14, %v2155_v20  ;;  %v2162_v27 = vor.u32 %v2618_v22, %v2161_v21  ;;  %v2105_v14 = vld [vmem:[#allocation5] sm:$0xf]  ;;  %v2603_v20 = vld [vmem:[#allocation5 + $0x4] sm:$0xf]  ;;  %v2107_v21 = vld [vmem:[#allocation5 + $0x10] sm:$0xf0] }
  0x4e   : > { %992 = vmatpush.bf16.msra.mxu3 %v2214_v29  ;;  %v2113_v22 = vld [vmem:[#allocation5 + $0x8] sm:$0xf] }
  0x50   : > { %954 = vmatpush.bf16.msra.mxu0 %v2186_v37  ;;  %v2145_v37 = vld [vmem:[#allocation5 + $0x48] sm:$0xf] }
  0x51   : > { %967 = vmatpush.bf16.msra.mxu1 %v2190_v44  ;;  %980 = vmatpush.bf16.msra.mxu2 %v2194_v45  ;;  %v2146_v44 = vor.u32 %v2614_v40, %v2145_v37  ;;  %v2147_v45 = vld [vmem:[#allocation5 + $0x58] sm:$0xf0] }
  0x52   : > { %993 = vmatpush.bf16.msra.mxu3 %v2198_v51  ;;  %v2121_v51 = vld [vmem:[#allocation5 + $0x20] sm:$0xf] }
  0x56   : > { %994 = vmatpush.bf16.msra.mxu3 %v2182_v8 }
  0xa2   : > { %v3049_v49 = vpop.f32.mrf.mxu0 }
  0xa3   : > { %v3051_v50 = vpop.f32.mrf.mxu1  ;;  %v346_v15 = vadd.f32 %v3049_v49, %v3056_v52  ;;  %v2163_v49 = vld [vmem:[#allocation5 + $0x78] sm:$0xf0] }
  0xa4   : > { %v365_v23 = vadd.f32 %v3051_v50, %v3060_v54  ;;  %v2138_v50 = vor.u32 %v2613_v33, %v2137_v32 }
  0xa9   : > { %v3058_v53 = vpop.f32.mrf.mxu2 }
  0xaa   : > { %v3062_v55 = vpop.f32.mrf.mxu3  ;;  %v347_v56 = vpop.f32.mrf.mxu0  ;;  %v384_v46 = vadd.f32 %v3058_v53, %v3072_v61  ;;  %v2131_v53 = vld [vmem:[#allocation5 + $0x38] sm:$0xf0] }
  0xab   : > { %v3065_v57 = vadd.f32 %v347_v56, %v3056_v52  ;;  %v366_v58 = vpop.f32.mrf.mxu1  ;;  %v2169_v56 = vld [vmem:[#allocation5 + $0x80] sm:$0xf] }
  0xac   : > { %v3068_v59 = vadd.f32 %v366_v58, %v3060_v54  ;;  %v2621_v58 = vld [vmem:[#allocation5 + $0x8c] sm:$0xf0] }
  0xad   : > { %v2170_v63 = vor.u32 %v2621_v58, %v2169_v56  ;;  %v2609_v56 = vld [vmem:[#allocation5 + $0x2c] sm:$0xf0]  ;;  %v2607_v58 = vld [vmem:[#allocation5 + $0x24] sm:$0xf] }
  0xaf   : > { %955 = vmatpush.bf16.msra.mxu0 %v2170_v63  ;;  %v2122_v63 = vor.u32 %v2609_v56, %v2121_v51 }
  0xb1   : > { %v385_v62 = vpop.f32.mrf.mxu2 }
  0xb2   : > { %v3075_v2 = vadd.f32 %v385_v62, %v3072_v61  ;;  %v404_v3 = vpop.f32.mrf.mxu3  ;;  %v350_v4 = vpop.f32.mrf.mxu0  ;;  %v2619_v62 = vld [vmem:[#allocation5 + $0x84] sm:$0xf] }
  0xb3   : > { %v3078_v9 = vadd.f32 %v404_v3, %v3070_v60  ;;  %v3081_v10 = vadd.f32 %v350_v4, %v3056_v52  ;;  %v369_v11 = vpop.f32.mrf.mxu1  ;;  %v2622_v3 = vld [vmem:[#allocation5 + $0x94] sm:$0xf0]  ;;  %v2174_v4 = vor.u32 %v2619_v62, %v2171_v0  ;;  %956 = vmatpush.bf16.msra.mxu0 %v2154_v19  ;;  %v2123_v0 = vld [vmem:[#allocation5 + $0x30] sm:$0xf0] }
  0xb4   : > { %v3084_v16 = vadd.f32 %v369_v11, %v3060_v54  ;;  %v2178_v5 = vor.u32 %v2622_v3, %v2177_v1  ;;  %v2129_v1 = vld [vmem:[#allocation5 + $0x28] sm:$0xf]  ;;  %v2610_v3 = vld [vmem:[#allocation5 + $0x34] sm:$0xf0]  ;;  %v2126_v7 = vor.u32 %v2607_v58, %v2123_v0 }
  0xb5   : > { %968 = vmatpush.bf16.msra.mxu1 %v2174_v4  ;;  %v2130_v8 = vor.u32 %v2610_v3, %v2129_v1  ;;  %v743_v3 = vld [vmem:[#allocation3] sm:$0xff] }
  0xb6   : > { %981 = vmatpush.bf16.msra.mxu2 %v2178_v5 }
  0xb7   : > { %957 = vmatpush.bf16.msra.mxu0 %v2138_v50 }
  0xb9   : > { %v388_v30 = vpop.f32.mrf.mxu2  ;;  %969 = vmatpush.bf16.msra.mxu1 %v2158_v26  ;;  %v2110_v26 = vor.u32 %v2603_v20, %v2107_v21 }
  0xba   : > { %v3087_v34 = vadd.f32 %v388_v30, %v3072_v61  ;;  %v407_v35 = vpop.f32.mrf.mxu3  ;;  %v352_v36 = vpop.f32.mrf.mxu0  ;;  %v2166_v30 = vor.u32 %v2616_v28, %v2163_v49  ;;  %982 = vmatpush.bf16.msra.mxu2 %v2162_v27  ;;  %v2606_v27 = vld [vmem:[#allocation5 + $0x14] sm:$0xf0] }
  0xbb   : > { %v3090_v41 = vadd.f32 %v407_v35, %v3070_v60  ;;  %v3093_v42 = vadd.f32 %v352_v36, %v3056_v52  ;;  %v371_v43 = vpop.f32.mrf.mxu1  ;;  %v2611_v35 = vld [vmem:[#allocation5 + $0x44] sm:$0xf]  ;;  %958 = vmatpush.bf16.msra.mxu0 %v2122_v63  ;;  %v2114_v49 = vor.u32 %v2606_v27, %v2113_v22 }
  0xbc   : > { %v3096_v48 = vadd.f32 %v371_v43, %v3060_v54  ;;  %995 = vmatpush.bf16.msra.mxu3 %v2166_v30  ;;  %v2139_v54 = vld [vmem:[#allocation5 + $0x50] sm:$0xf0]  ;;  %v2612_v43 = vld [vmem:[#allocation5 + $0x4c] sm:$0xf]  ;;  %v2663_v27 = vld [vmem:[#allocation5 + $0xe4] sm:$0xf] }
  0xbd   : > { %v2142_v39 = vor.u32 %v2611_v35, %v2139_v54  ;;  %v2150_v47 = vor.u32 %v2612_v43, %v2147_v45  ;;  %v403_v35 = vadd.f32 %v3062_v55, %v3070_v60 }
  0xbe   : > { %983 = vmatpush.bf16.msra.mxu2 %v2146_v44 }
  0xbf   : > { %970 = vmatpush.bf16.msra.mxu1 %v2142_v39 }
  0xc0   : > { %996 = vmatpush.bf16.msra.mxu3 %v2150_v47 }
  0xc1   : > { %v390_v11 = vpop.f32.mrf.mxu2 }
  0xc2   : > { %v3101_v17 = vadd.f32 %v390_v11, %v3072_v61  ;;  %v409_v18 = vpop.f32.mrf.mxu3  ;;  %v2608_v11 = vld [vmem:[#allocation5 + $0x2c] sm:$0xf]  ;;  %984 = vmatpush.bf16.msra.mxu2 %v2130_v8 }
  0xc3   : > { %v3106_v24 = vadd.f32 %v409_v18, %v3070_v60  ;;  %v638_v25 = vpop.f32.mrf.mxu0  ;;  %v2134_v12 = vor.u32 %v2608_v11, %v2131_v53  ;;  %971 = vmatpush.bf16.msra.mxu1 %v2126_v7 }
  0xc4   : > { %v681_v52 = vadd.f32 %v638_v25, %v346_v15  ;;  %v651_v29 = vpop.f32.mrf.mxu1  ;;  %v2605_v15 = vld [vmem:[#allocation5 + $0xc] sm:$0xf0] }
  0xc5   : > { %v682_v31 = vadd.f32 %v651_v29, %v365_v23  ;;  %v2106_v19 = vor.u32 %v2605_v15, %v2105_v14  ;;  %997 = vmatpush.bf16.msra.mxu3 %v2134_v12  ;;  %v2115_v29 = vld [vmem:[#allocation5 + $0x18] sm:$0xf0] }
  0xc6   : > { %v2100_v36 = vmul.f32 -1.442695, %v681_v52  ;;  %v2604_v52 = vld [vmem:[#allocation5 + $0xc] sm:$0xf]  ;;  %985 = vmatpush.bf16.msra.mxu2 %v2114_v49  ;;  %v2350_v49 = vld [vmem:[#allocation5 + $0xf0] sm:$0xf0] }
  0xc7   : > { %v2101_v38 = vmul.f32 -1.442695, %v682_v31  ;;  %959 = vmatpush.bf16.msra.mxu0 %v2106_v19  ;;  %972 = vmatpush.bf16.msra.mxu1 %v2110_v26  ;;  %v2118_v32 = vor.u32 %v2604_v52, %v2115_v29  ;;  %v2665_v26 = vld [vmem:[#allocation5 + $0xec] sm:$0xf0]  ;;  %v2356_v52 = vld [vmem:[#allocation5 + $0xe8] sm:$0xf] }
  0xc8   : > { %2756 = vpow2.f32 %v2100_v36  ;;  %v2666_v29 = vld [vmem:[#allocation5 + $0xf4] sm:$0xf0] }
  0xc9   : > { %2758 = vpow2.f32 %v2101_v38  ;;  %998 = vmatpush.bf16.msra.mxu3 %v2118_v32  ;;  %v2664_v32 = vld [vmem:[#allocation5 + $0xec] sm:$0xf] }
  0xca   : > { %v664_v62 = vpop.f32.mrf.mxu2 }
  0xcb   : > { %v683_v4 = vadd.f32 %v664_v62, %v384_v46  ;;  %v677_v5 = vpop.f32.mrf.mxu3  ;;  %v640_v6 = vpop.f32.mrf.mxu0 }
  0xcc   : > { %v653_v61 = vpop.f32.mrf.mxu1  ;;  %v684_v54 = vadd.f32 %v677_v5, %v403_v35 }
  0xcd   : > { %v2102_v13 = vmul.f32 -1.442695, %v683_v4 }
  0xce   : > { %v2757_v18 = vpop.eup %2756 }
  0xcf   : > { %v2759_v23 = vpop.eup %2758  ;;  %v694_v25 = vadd.f32 1.0, %v2757_v18  ;;  %2760 = vpow2.f32 %v2102_v13 }
  0xd0   : > { %v695_v28 = vadd.f32 1.0, %v2759_v23 }
  0xd1   : > { %2762 = vrcp.f32 %v694_v25  ;;  %v708_v44 = vand.u32 2147483648, %v694_v25  ;;  %v706_v47 = vand.u32 2147483647, %v694_v25  ;;  %vm702_vm3 = vweird.f32 %v694_v25 }
  0xd2   : > { %2764 = vrcp.f32 %v695_v28  ;;  %v666_v30 = vpop.f32.mrf.mxu2  ;;  %v723_v45 = vand.u32 2147483648, %v695_v28  ;;  %v721_v56 = vand.u32 2147483647, %v695_v28  ;;  %vm717_vm4 = vweird.f32 %v695_v28 }
  0xd3   : > { %v679_v31 = vpop.f32.mrf.mxu3  ;;  %v709_v62 = vor.u32 1.1754944e-38, %v708_v44  ;;  %vm707_vm7 = vcmp.eq.f32.partialorder %v706_v47, 8.507059e+37  ;;  %v2353_v30 = vor.u32 %v2663_v27, %v2350_v49  ;;  %v2292_v27 = vld [vmem:[#allocation5 + $0x68] sm:$0xf] }
  0xd4   : > { %v724_v0 = vor.u32 1.1754944e-38, %v723_v45  ;;  %vm722_vm8 = vcmp.eq.f32.partialorder %v721_v56, 8.507059e+37  ;;  %v2357_v31 = vor.u32 %v2666_v29, %v2356_v52  ;;  %v2660_v45 = vld [vmem:[#allocation5 + $0xcc] sm:$0xf]  ;;  %v2657_v56 = vld [vmem:[#allocation5 + $0xac] sm:$0xf0] }
  0xd5   : > { %v2761_v33 = vpop.eup %2760  ;;  %1288 = vmatpush.bf16.msrb.mxu1 %v2353_v30 }
  0xd6   : > { %v696_v36 = vadd.f32 1.0, %v2761_v33  ;;  %v2358_v33 = vld [vmem:[#allocation5 + $0xf8] sm:$0xf0]  ;;  %1301 = vmatpush.bf16.msrb.mxu2 %v2357_v31  ;;  %v2648_v31 = vld [vmem:[#allocation5 + $0x6c] sm:$0xf] }
  0xd7   : > { %v2763_v50 = vpop.eup %2762  ;;  %v2361_v35 = vor.u32 %v2664_v32, %v2358_v33  ;;  %v2294_v32 = vld [vmem:[#allocation5 + $0x78] sm:$0xf0] }
  0xd8   : > { %v2765_v37 = vpop.eup %2764  ;;  %v698_v38 = vmul.f32 %v2763_v50, %v694_v25  ;;  %2766 = vrcp.f32 %v696_v36  ;;  %vm703_vm1 = vweird.f32 %v2763_v50  ;;  %v738_v14 = vand.u32 2147483648, %v696_v36  ;;  %v2348_v25 = vld [vmem:[#allocation5 + $0xe0] sm:$0xf] }
  0xd9   : > { %v713_v39 = vmul.f32 %v2765_v37, %v695_v28  ;;  %2768 = vtanh.f32 %v684_v54  ;;  %vm718_vm2 = vweird.f32 %v2765_v37  ;;  %vm704_vm5 = vmor %vm702_vm3, %vm703_vm1  ;;  %vm732_vm10 = vweird.f32 %v696_v36  ;;  %v2659_v54 = vld [vmem:[#allocation5 + $0xc4] sm:$0xf]  ;;  %1314 = vmatpush.bf16.msrb.mxu3 %v2361_v35 }
  0xda   : > { %v699_v40 = vsub.f32 1.0, %v698_v38  ;;  %vm719_vm6 = vmor %vm717_vm4, %vm718_vm2  ;;  %v736_v15 = vand.u32 2147483647, %v696_v36  ;;  %v739_v19 = vor.u32 1.1754944e-38, %v738_v14  ;;  %v2349_v28 = vor.u32 %v2665_v26, %v2348_v25  ;;  %v2334_v38 = vld [vmem:[#allocation5 + $0xd0] sm:$0xf0] }
  0xdb   : > { %v714_v43 = vsub.f32 1.0, %v713_v39  ;;  %v2340_v39 = vld [vmem:[#allocation5 + $0xc8] sm:$0xf]  ;;  %v2286_v26 = vld [vmem:[#allocation5 + $0x70] sm:$0xf0] }
  0xdc   : > { %v700_v46 = vmul.f32 %v2763_v50, %v699_v40  ;;  %vm737_vm12 = vcmp.eq.f32.partialorder %v736_v15, 8.507059e+37  ;;  %1275 = vmatpush.bf16.msrb.mxu0 %v2349_v28  ;;  %v2662_v40 = vld [vmem:[#allocation5 + $0xd4] sm:$0xf0] }
  0xdd   : > { %v715_v51 = vmul.f32 %v2765_v37, %v714_v43  ;;  %v2337_v43 = vor.u32 %v2659_v54, %v2334_v38  ;;  %v2341_v44 = vor.u32 %v2662_v40, %v2340_v39  ;;  %v2650_v28 = vld [vmem:[#allocation5 + $0x74] sm:$0xf0]  ;;  %v2645_v54 = vld [vmem:[#allocation5 + $0x4c] sm:$0xf0] }
  0xde   : > { %v2767_v55 = vpop.eup %2766  ;;  %v701_v60 = vadd.f32 %v2763_v50, %v700_v46  ;;  %v2342_v46 = vld [vmem:[#allocation5 + $0xd8] sm:$0xf0]  ;;  %v2293_v30 = vor.u32 %v2650_v28, %v2292_v27 }
  0xdf   : > { %v728_v58 = vmul.f32 %v2767_v55, %v696_v36  ;;  %v716_v63 = vadd.f32 %v2765_v37, %v715_v51  ;;  %v2769_v4 = vpop.eup %2768  ;;  %vm733_vm9 = vweird.f32 %v2767_v55  ;;  %v2332_v36 = vld [vmem:[#allocation5 + $0xc0] sm:$0xf]  ;;  %v2345_v47 = vor.u32 %v2660_v45, %v2342_v46  ;;  %1289 = vmatpush.bf16.msrb.mxu1 %v2337_v43  ;;  %1302 = vmatpush.bf16.msrb.mxu2 %v2341_v44  ;;  %v2270_v43 = vld [vmem:[#allocation5 + $0x50] sm:$0xf0]  ;;  %v2276_v45 = vld [vmem:[#allocation5 + $0x48] sm:$0xf] }
  0xe0   : > { %v705_v1 = vsel %vm704_vm5, %v2763_v50, %v701_v60  ;;  %vm734_vm11 = vmor %vm732_vm10, %vm733_vm9  ;;  %v2661_v50 = vld [vmem:[#allocation5 + $0xcc] sm:$0xf0]  ;;  %v2316_v51 = vld [vmem:[#allocation5 + $0xa0] sm:$0xf] }
  0xe1   : > { %v729_v5 = vsub.f32 1.0, %v728_v58  ;;  %v710_v6 = vsel %vm707_vm7, %v709_v62, %v705_v1  ;;  %v720_v7 = vsel %vm719_vm6, %v2765_v37, %v716_v63  ;;  %v2333_v37 = vor.u32 %v2661_v50, %v2332_v36  ;;  %1315 = vmatpush.bf16.msrb.mxu3 %v2345_v47  ;;  %v2318_v58 = vld [vmem:[#allocation5 + $0xb0] sm:$0xf0]  ;;  %v2324_v62 = vld [vmem:[#allocation5 + $0xa8] sm:$0xf] }
  0xe2   : > { %v725_v8 = vsel %vm722_vm8, %v724_v0, %v720_v7  ;;  %v745_v11 = vmul.f32 %v2769_v4, %v710_v6  ;;  %v2317_v60 = vor.u32 %v2657_v56, %v2316_v51  ;;  %v2658_v63 = vld [vmem:[#allocation5 + $0xb4] sm:$0xf0]  ;;  %v2326_v4 = vld [vmem:[#allocation5 + $0xb8] sm:$0xf0]  ;;  %v2300_v6 = vld [vmem:[#allocation5 + $0x80] sm:$0xf]  ;;  %v2297_v36 = vor.u32 %v2648_v31, %v2294_v32 }
  0xe3   : > { %v730_v53 = vmul.f32 %v2767_v55, %v729_v5  ;;  %v744_v61 = vmul.f32 %v743_v3, %v725_v8  ;;  %1276 = vmatpush.bf16.msrb.mxu0 %v2333_v37  ;;  %v2325_v1 = vor.u32 %v2658_v63, %v2324_v62  ;;  %v2656_v3 = vld [vmem:[#allocation5 + $0xac] sm:$0xf]  ;;  %v2653_v7 = vld [vmem:[#allocation5 + $0x8c] sm:$0xf0]  ;;  %v2651_v8 = vld [vmem:[#allocation5 + $0x84] sm:$0xf] }
  0xe4   : > { %v2329_v5 = vor.u32 %v2656_v3, %v2326_v4  ;;  %v2268_v50 = vld [vmem:[#allocation5 + $0x40] sm:$0xf]  ;;  %v2643_v37 = vld [vmem:[#allocation5 + $0x44] sm:$0xf]  ;;  %v2646_v46 = vld [vmem:[#allocation5 + $0x54] sm:$0xf0] }
  0xe5   : > { %v3112_v12 = vadd.f32 %v745_v11, %v744_v61  ;;  %v731_v13 = vadd.f32 %v2767_v55, %v730_v53  ;;  %1303 = vmatpush.bf16.msrb.mxu2 %v2325_v1  ;;  %v2301_v11 = vor.u32 %v2653_v7, %v2300_v6  ;;  %v2302_v53 = vld [vmem:[#allocation5 + $0x90] sm:$0xf0]  ;;  %v2308_v61 = vld [vmem:[#allocation5 + $0x88] sm:$0xf]  ;;  %v2269_v40 = vor.u32 %v2645_v54, %v2268_v50  ;;  %v2644_v47 = vld [vmem:[#allocation5 + $0x4c] sm:$0xf] }
  0xe6   : > { %1316 = vmatpush.bf16.msrb.mxu3 %v2329_v5  ;;  %v2305_v14 = vor.u32 %v2651_v8, %v2302_v53  ;;  %v2273_v44 = vor.u32 %v2643_v37, %v2270_v43  ;;  %v2252_v56 = vld [vmem:[#allocation5 + $0x20] sm:$0xf]  ;;  %v2260_v1 = vld [vmem:[#allocation5 + $0x28] sm:$0xf]  ;;  %v2642_v3 = vld [vmem:[#allocation5 + $0x34] sm:$0xf0] }
  0xe7   : > { %2770 = vtanh.f32 %v3112_v12  ;;  %v735_v18 = vsel %vm734_vm11, %v2767_v55, %v731_v13  ;;  %v2655_v55 = vld [vmem:[#allocation5 + $0xa4] sm:$0xf]  ;;  %1277 = vmatpush.bf16.msrb.mxu0 %v2317_v60  ;;  %v2654_v13 = vld [vmem:[#allocation5 + $0x94] sm:$0xf0]  ;;  %v2261_v8 = vor.u32 %v2642_v3, %v2260_v1  ;;  %v2262_v53 = vld [vmem:[#allocation5 + $0x38] sm:$0xf0] }
  0xe8   : > { %v740_v21 = vsel %vm737_vm12, %v739_v19, %v735_v18  ;;  %v2321_v0 = vor.u32 %v2655_v55, %v2318_v58  ;;  %v2309_v15 = vor.u32 %v2654_v13, %v2308_v61  ;;  %v2652_v18 = vld [vmem:[#allocation5 + $0x8c] sm:$0xf]  ;;  %v2310_v19 = vld [vmem:[#allocation5 + $0x98] sm:$0xf0]  ;;  %v2641_v55 = vld [vmem:[#allocation5 + $0x2c] sm:$0xf0] }
  0xe9   : > { %v2639_v60 = vld [vmem:[#allocation5 + $0x24] sm:$0xf]  ;;  %v2253_v63 = vor.u32 %v2641_v55, %v2252_v56 }
  0xea   : > { %1290 = vmatpush.bf16.msrb.mxu1 %v2321_v0  ;;  %1304 = vmatpush.bf16.msrb.mxu2 %v2309_v15  ;;  %v2254_v0 = vld [vmem:[#allocation5 + $0x30] sm:$0xf0]  ;;  %v2637_v15 = vld [vmem:[#allocation5 + $0xc] sm:$0xf0] }
  0xeb   : > { %1278 = vmatpush.bf16.msrb.mxu0 %v2301_v11  ;;  %v2257_v7 = vor.u32 %v2639_v60, %v2254_v0  ;;  %v2640_v11 = vld [vmem:[#allocation5 + $0x2c] sm:$0xf] }
  0xec   : > { %v2265_v61 = vor.u32 %v2640_v11, %v2262_v53 }
  0xed   : > { %v2771_v20 = vpop.eup %2770 }
  0xee   : > { %v748_v22 = vmul.f32 %v2771_v20, %v740_v21  ;;  %v2313_v20 = vor.u32 %v2652_v18, %v2310_v19  ;;  %1291 = vmatpush.bf16.msrb.mxu1 %v2305_v14  ;;  %v2284_v21 = vld [vmem:[#allocation5 + $0x60] sm:$0xf]  ;;  %1305 = vmatpush.bf16.msrb.mxu2 %v2293_v30 }
  0xef   : > { %v2236_v14 = vld [vmem:[#allocation5] sm:$0xf] }
  0xf0   : > { %v759_v23 = vpack.c.bf16 %v748_v22, %v748_v22  ;;  %v2649_v22 = vld [vmem:[#allocation5 + $0x6c] sm:$0xf0]  ;;  %1317 = vmatpush.bf16.msrb.mxu3 %v2313_v20  ;;  %v2237_v19 = vor.u32 %v2637_v15, %v2236_v14  ;;  %v2635_v20 = vld [vmem:[#allocation5 + $0x4] sm:$0xf] }
  0xf1   : > { %v2285_v25 = vor.u32 %v2649_v22, %v2284_v21  ;;  %v2238_v21 = vld [vmem:[#allocation5 + $0x10] sm:$0xf0]  ;;  %v2244_v22 = vld [vmem:[#allocation5 + $0x8] sm:$0xf] }
  0xf2   : > { %960 = vmatmul.bf16.vlgmr.msra.gmra.mxu0 %v759_v23  ;;  %973 = vmatmul.bf16.vlgmr.msra.gmra.mxu1 %v759_v23 }
  0xf3   : > { %986 = vmatmul.bf16.vlgmr.msra.gmra.mxu2 %v759_v23  ;;  %999 = vmatmul.bf16.vlgmr.msra.gmra.mxu3 %v759_v23  ;;  %v2647_v23 = vld [vmem:[#allocation5 + $0x64] sm:$0xf] }
  0xf4   : > { %v2289_v29 = vor.u32 %v2647_v23, %v2286_v26  ;;  %1279 = vmatpush.bf16.msrb.mxu0 %v2285_v25  ;;  %1318 = vmatpush.bf16.msrb.mxu3 %v2297_v36  ;;  %v2241_v25 = vor.u32 %v2635_v20, %v2238_v21  ;;  %v2638_v26 = vld [vmem:[#allocation5 + $0x14] sm:$0xf0]  ;;  %v2695_v20 = vld [vmem:[#allocation5 + $0xe4] sm:$0xf] }
  0xf5   : > { %v2245_v28 = vor.u32 %v2638_v26, %v2244_v22  ;;  %v2481_v22 = vld [vmem:[#allocation5 + $0xf0] sm:$0xf0] }
  0xf6   : > { %1292 = vmatpush.bf16.msrb.mxu1 %v2289_v29 }
  0xf8   : > { %1280 = vmatpush.bf16.msrb.mxu0 %v2269_v40 }
  0xfa   : > { %1293 = vmatpush.bf16.msrb.mxu1 %v2273_v44 }
  0xfc   : > { %1281 = vmatpush.bf16.msrb.mxu0 %v2253_v63 }
  0xfe   : > { %1294 = vmatpush.bf16.msrb.mxu1 %v2257_v7 }
 0x100   : > { %1282 = vmatpush.bf16.msrb.mxu0 %v2237_v19  ;;  %v2697_v19 = vld [vmem:[#allocation5 + $0xec] sm:$0xf0] }
 0x102   : > { %1295 = vmatpush.bf16.msrb.mxu1 %v2241_v25  ;;  %v2484_v25 = vor.u32 %v2695_v20, %v2481_v22  ;;  %v2680_v22 = vld [vmem:[#allocation5 + $0x6c] sm:$0xf] }
 0x106   : > { %1611 = vmatpush.bf16.msra.mxu1 %v2484_v25 }
 0x16f   : > { %v961_v49 = vpop.f32.mrf.mxu0  ;;  %v974_v52 = vpop.f32.mrf.mxu1 }
 0x170   : > { %v1004_v33 = vadd.f32 %v961_v49, %v3065_v57  ;;  %v1005_v35 = vadd.f32 %v974_v52, %v3068_v59  ;;  %v2277_v57 = vor.u32 %v2646_v46, %v2276_v45  ;;  %v2278_v59 = vld [vmem:[#allocation5 + $0x58] sm:$0xf0]  ;;  %v2636_v49 = vld [vmem:[#allocation5 + $0xc] sm:$0xf] }
 0x171   : > { %v2281_v51 = vor.u32 %v2644_v47, %v2278_v59  ;;  %v2246_v52 = vld [vmem:[#allocation5 + $0x18] sm:$0xf0] }
 0x172   : > { %v2231_v38 = vmul.f32 -1.442695, %v1004_v33  ;;  %v2232_v39 = vmul.f32 -1.442695, %v1005_v35  ;;  %1306 = vmatpush.bf16.msrb.mxu2 %v2277_v57  ;;  %v2249_v31 = vor.u32 %v2636_v49, %v2246_v52  ;;  %v2463_v52 = vld [vmem:[#allocation5 + $0xc0] sm:$0xf] }
 0x173   : > { %1319 = vmatpush.bf16.msrb.mxu3 %v2281_v51 }
 0x174   : > { %2772 = vpow2.f32 %v2231_v38 }
 0x175   : > { %2774 = vpow2.f32 %v2232_v39 }
 0x176   : > { %v987_v58 = vpop.f32.mrf.mxu2  ;;  %v1000_v62 = vpop.f32.mrf.mxu3  ;;  %1307 = vmatpush.bf16.msrb.mxu2 %v2261_v8 }
 0x177   : > { %v1006_v4 = vadd.f32 %v987_v58, %v3075_v2  ;;  %v963_v5 = vpop.f32.mrf.mxu0  ;;  %v976_v6 = vpop.f32.mrf.mxu1  ;;  %1320 = vmatpush.bf16.msrb.mxu3 %v2265_v61  ;;  %v1007_v36 = vadd.f32 %v1000_v62, %v3078_v9 }
 0x179   : > { %v2233_v13 = vmul.f32 -1.442695, %v1006_v4 }
 0x17a   : > { %v2773_v18 = vpop.eup %2772  ;;  %1308 = vmatpush.bf16.msrb.mxu2 %v2245_v28  ;;  %v2489_v28 = vld [vmem:[#allocation5 + $0xf8] sm:$0xf0] }
 0x17b   : > { %v2775_v2 = vpop.eup %2774  ;;  %v1017_v23 = vadd.f32 1.0, %v2773_v18  ;;  %2776 = vpow2.f32 %v2233_v13  ;;  %1321 = vmatpush.bf16.msrb.mxu3 %v2249_v31 }
 0x17c   : > { %v1018_v27 = vadd.f32 1.0, %v2775_v2  ;;  %v2487_v2 = vld [vmem:[#allocation5 + $0xe8] sm:$0xf] }
 0x17d   : > { %2778 = vrcp.f32 %v1017_v23  ;;  %v1031_v40 = vand.u32 2147483648, %v1017_v23  ;;  %v1029_v45 = vand.u32 2147483647, %v1017_v23  ;;  %vm1025_vm15 = vweird.f32 %v1017_v23 }
 0x17e   : > { %2780 = vrcp.f32 %v1018_v27  ;;  %v989_v29 = vpop.f32.mrf.mxu2  ;;  %v1002_v30 = vpop.f32.mrf.mxu3  ;;  %v1046_v43 = vand.u32 2147483648, %v1018_v27  ;;  %v1044_v47 = vand.u32 2147483647, %v1018_v27  ;;  %vm1040_vm0 = vweird.f32 %v1018_v27 }
 0x17f   : > { %v1032_v51 = vor.u32 1.1754944e-38, %v1031_v40  ;;  %vm1030_vm3 = vcmp.eq.f32.partialorder %v1029_v45, 8.507059e+37  ;;  %v2693_v29 = vld [vmem:[#allocation5 + $0xcc] sm:$0xf0]  ;;  %v2691_v30 = vld [vmem:[#allocation5 + $0xc4] sm:$0xf] }
 0x180   : > { %v1047_v55 = vor.u32 1.1754944e-38, %v1046_v43  ;;  %vm1045_vm4 = vcmp.eq.f32.partialorder %v1044_v47, 8.507059e+37  ;;  %v2464_v31 = vor.u32 %v2693_v29, %v2463_v52  ;;  %v2689_v40 = vld [vmem:[#allocation5 + $0xac] sm:$0xf0]  ;;  %v2687_v43 = vld [vmem:[#allocation5 + $0xa4] sm:$0xf] }
 0x181   : > { %v2777_v32 = vpop.eup %2776  ;;  %v2449_v45 = vld [vmem:[#allocation5 + $0xb0] sm:$0xf0]  ;;  %v2690_v47 = vld [vmem:[#allocation5 + $0xb4] sm:$0xf0] }
 0x182   : > { %v1019_v33 = vadd.f32 1.0, %v2777_v32  ;;  %v2465_v32 = vld [vmem:[#allocation5 + $0xd0] sm:$0xf0] }
 0x183   : > { %v2779_v35 = vpop.eup %2778 }
 0x184   : > { %v2781_v50 = vpop.eup %2780  ;;  %v1021_v54 = vmul.f32 %v2779_v35, %v1017_v23  ;;  %2782 = vrcp.f32 %v1019_v33  ;;  %vm1026_vm13 = vweird.f32 %v2779_v35  ;;  %v1061_v8 = vand.u32 2147483648, %v1019_v33  ;;  %v2698_v23 = vld [vmem:[#allocation5 + $0xf4] sm:$0xf0] }
 0x185   : > { %v1036_v37 = vmul.f32 %v2781_v50, %v1018_v27  ;;  %2784 = vtanh.f32 %v1007_v36  ;;  %vm1041_vm14 = vweird.f32 %v2781_v50  ;;  %vm1027_vm1 = vmor %vm1025_vm15, %vm1026_vm13  ;;  %vm1055_vm6 = vweird.f32 %v1019_v33  ;;  %v2696_v27 = vld [vmem:[#allocation5 + $0xec] sm:$0xf] }
 0x186   : > { %v1022_v38 = vsub.f32 1.0, %v1021_v54  ;;  %vm1042_vm2 = vmor %vm1040_vm0, %vm1041_vm14  ;;  %v1059_v11 = vand.u32 2147483647, %v1019_v33  ;;  %v1062_v61 = vor.u32 1.1754944e-38, %v1061_v8  ;;  %v2488_v26 = vor.u32 %v2698_v23, %v2487_v2  ;;  %v2692_v54 = vld [vmem:[#allocation5 + $0xcc] sm:$0xf] }
 0x187   : > { %v1037_v39 = vsub.f32 1.0, %v1036_v37  ;;  %v2492_v49 = vor.u32 %v2696_v27, %v2489_v28  ;;  %v2468_v36 = vor.u32 %v2691_v30, %v2465_v32  ;;  %v2473_v37 = vld [vmem:[#allocation5 + $0xd8] sm:$0xf0]  ;;  %v2399_v27 = vld [vmem:[#allocation5 + $0x40] sm:$0xf] }
 0x188   : > { %v1023_v44 = vmul.f32 %v2779_v35, %v1022_v38  ;;  %vm1060_vm8 = vcmp.eq.f32.partialorder %v1059_v11, 8.507059e+37  ;;  %1624 = vmatpush.bf16.msra.mxu2 %v2488_v26  ;;  %v2476_v38 = vor.u32 %v2692_v54, %v2473_v37  ;;  %v2415_v11 = vld [vmem:[#allocation5 + $0x60] sm:$0xf]  ;;  %v2425_v2 = vld [vmem:[#allocation5 + $0x78] sm:$0xf0] }
 0x189   : > { %v1038_v46 = vmul.f32 %v2781_v50, %v1037_v39  ;;  %1637 = vmatpush.bf16.msra.mxu3 %v2492_v49  ;;  %1612 = vmatpush.bf16.msra.mxu1 %v2468_v36  ;;  %v2447_v39 = vld [vmem:[#allocation5 + $0xa0] sm:$0xf]  ;;  %v2428_v26 = vor.u32 %v2680_v22, %v2425_v2  ;;  %v2677_v28 = vld [vmem:[#allocation5 + $0x4c] sm:$0xf0]  ;;  %v2675_v49 = vld [vmem:[#allocation5 + $0x44] sm:$0xf] }
 0x18a   : > { %v2783_v57 = vpop.eup %2782  ;;  %v1024_v59 = vadd.f32 %v2779_v35, %v1023_v44  ;;  %v2448_v44 = vor.u32 %v2689_v40, %v2447_v39  ;;  %v2400_v30 = vor.u32 %v2677_v28, %v2399_v27  ;;  %v2676_v36 = vld [vmem:[#allocation5 + $0x4c] sm:$0xf]  ;;  %v2383_v54 = vld [vmem:[#allocation5 + $0x20] sm:$0xf]  ;;  %v2673_v37 = vld [vmem:[#allocation5 + $0x2c] sm:$0xf0] }
 0x18b   : > { %v1051_v9 = vmul.f32 %v2783_v57, %v1019_v33  ;;  %v1039_v56 = vadd.f32 %v2781_v50, %v1038_v46  ;;  %v2785_v58 = vpop.eup %2784  ;;  %vm1056_vm5 = vweird.f32 %v2783_v57  ;;  %v2471_v33 = vld [vmem:[#allocation5 + $0xc8] sm:$0xf] }
 0x18c   : > { %v1028_v60 = vsel %vm1027_vm1, %v2779_v35, %v1024_v59  ;;  %vm1057_vm7 = vmor %vm1055_vm6, %vm1056_vm5  ;;  %v2694_v35 = vld [vmem:[#allocation5 + $0xd4] sm:$0xf0]  ;;  %v2455_v46 = vld [vmem:[#allocation5 + $0xa8] sm:$0xf] }
 0x18d   : > { %v1052_v62 = vsub.f32 1.0, %v1051_v9  ;;  %v1033_v63 = vsel %vm1030_vm3, %v1032_v51, %v1028_v60  ;;  %v1043_v0 = vsel %vm1042_vm2, %v2781_v50, %v1039_v56  ;;  %v2472_v50 = vor.u32 %v2694_v35, %v2471_v33  ;;  %1638 = vmatpush.bf16.msra.mxu3 %v2476_v38  ;;  %v2688_v9 = vld [vmem:[#allocation5 + $0xac] sm:$0xf]  ;;  %v2457_v51 = vld [vmem:[#allocation5 + $0xb8] sm:$0xf0] }
 0x18e   : > { %v1048_v1 = vsel %vm1045_vm4, %v1047_v55, %v1043_v0  ;;  %v1068_v3 = vmul.f32 %v2785_v58, %v1033_v63  ;;  %v2456_v59 = vor.u32 %v2690_v47, %v2455_v46  ;;  %v2460_v56 = vor.u32 %v2688_v9, %v2457_v51  ;;  %v2431_v55 = vld [vmem:[#allocation5 + $0x80] sm:$0xf]  ;;  %v2685_v60 = vld [vmem:[#allocation5 + $0x8c] sm:$0xf0]  ;;  %v2683_v58 = vld [vmem:[#allocation5 + $0x84] sm:$0xf] }
 0x18f   : > { %v1053_v4 = vmul.f32 %v2783_v57, %v1052_v62  ;;  %v1067_v5 = vmul.f32 %v1048_v1, %v3112_v12  ;;  %v2479_v12 = vld [vmem:[#allocation5 + $0xe0] sm:$0xf]  ;;  %1625 = vmatpush.bf16.msra.mxu2 %v2472_v50  ;;  %v2432_v62 = vor.u32 %v2685_v60, %v2431_v55  ;;  %v2433_v63 = vld [vmem:[#allocation5 + $0x90] sm:$0xf0]  ;;  %v2439_v0 = vld [vmem:[#allocation5 + $0x88] sm:$0xf] }
 0x190   : > { %v2480_v21 = vor.u32 %v2697_v19, %v2479_v12  ;;  %v2686_v1 = vld [vmem:[#allocation5 + $0x94] sm:$0xf0]  ;;  %v2407_v33 = vld [vmem:[#allocation5 + $0x48] sm:$0xf]  ;;  %v2671_v38 = vld [vmem:[#allocation5 + $0x24] sm:$0xf] }
 0x191   : > { %v3120_v6 = vadd.f32 %v1068_v3, %v1067_v5  ;;  %v1054_v7 = vadd.f32 %v2783_v57, %v1053_v4  ;;  %1639 = vmatpush.bf16.msra.mxu3 %v2460_v56  ;;  %v2436_v3 = vor.u32 %v2683_v58, %v2433_v63  ;;  %v2440_v4 = vor.u32 %v2686_v1, %v2439_v0  ;;  %v2684_v5 = vld [vmem:[#allocation5 + $0x8c] sm:$0xf]  ;;  %v2678_v35 = vld [vmem:[#allocation5 + $0x54] sm:$0xf0]  ;;  %v2393_v55 = vld [vmem:[#allocation5 + $0x38] sm:$0xf0] }
 0x192   : > { %1598 = vmatpush.bf16.msra.mxu0 %v2480_v21  ;;  %v2674_v46 = vld [vmem:[#allocation5 + $0x34] sm:$0xf0]  ;;  %v2672_v56 = vld [vmem:[#allocation5 + $0x2c] sm:$0xf]  ;;  %v2669_v63 = vld [vmem:[#allocation5 + $0xc] sm:$0xf0] }
 0x193   : > { %2786 = vtanh.f32 %v3120_v6  ;;  %v1058_v53 = vsel %vm1057_vm7, %v2783_v57, %v1054_v7  ;;  %v2452_v57 = vor.u32 %v2687_v43, %v2449_v45  ;;  %1626 = vmatpush.bf16.msra.mxu2 %v2456_v59  ;;  %v2441_v7 = vld [vmem:[#allocation5 + $0x98] sm:$0xf0]  ;;  %v2384_v43 = vor.u32 %v2673_v37, %v2383_v54  ;;  %v2391_v45 = vld [vmem:[#allocation5 + $0x28] sm:$0xf] }
 0x194   : > { %v1063_v14 = vsel %vm1060_vm8, %v1062_v61, %v1058_v53  ;;  %v2444_v8 = vor.u32 %v2684_v5, %v2441_v7  ;;  %v2681_v53 = vld [vmem:[#allocation5 + $0x6c] sm:$0xf0]  ;;  %v2679_v61 = vld [vmem:[#allocation5 + $0x64] sm:$0xf]  ;;  %v2392_v51 = vor.u32 %v2674_v46, %v2391_v45  ;;  %v2396_v60 = vor.u32 %v2672_v56, %v2393_v55  ;;  %v2375_v5 = vld [vmem:[#allocation5 + $0x8] sm:$0xf] }
 0x195   : > { %1613 = vmatpush.bf16.msra.mxu1 %v2452_v57 }
 0x196   : > { %1599 = vmatpush.bf16.msra.mxu0 %v2464_v31  ;;  %1640 = vmatpush.bf16.msra.mxu3 %v2444_v8  ;;  %v2401_v31 = vld [vmem:[#allocation5 + $0x50] sm:$0xf0] }
 0x197   : > { %1627 = vmatpush.bf16.msra.mxu2 %v2440_v4  ;;  %v2404_v32 = vor.u32 %v2675_v49, %v2401_v31  ;;  %v2369_v4 = vld [vmem:[#allocation5 + $0x10] sm:$0xf0] }
 0x199   : > { %v2787_v13 = vpop.eup %2786  ;;  %1614 = vmatpush.bf16.msra.mxu1 %v2436_v3  ;;  %v2667_v3 = vld [vmem:[#allocation5 + $0x4] sm:$0xf] }
 0x19a   : > { %v1071_v15 = vmul.f32 %v2787_v13, %v1063_v14  ;;  %1600 = vmatpush.bf16.msra.mxu0 %v2448_v44  ;;  %v2416_v13 = vor.u32 %v2681_v53, %v2415_v11  ;;  %v2417_v14 = vld [vmem:[#allocation5 + $0x70] sm:$0xf0]  ;;  %1641 = vmatpush.bf16.msra.mxu3 %v2428_v26  ;;  %v2372_v8 = vor.u32 %v2667_v3, %v2369_v4  ;;  %v2670_v11 = vld [vmem:[#allocation5 + $0x14] sm:$0xf0] }
 0x19b   : > { %v2420_v20 = vor.u32 %v2679_v61, %v2417_v14  ;;  %v2385_v44 = vld [vmem:[#allocation5 + $0x30] sm:$0xf0]  ;;  %v2376_v61 = vor.u32 %v2670_v11, %v2375_v5  ;;  %v2377_v14 = vld [vmem:[#allocation5 + $0x18] sm:$0xf0] }
 0x19c   : > { %v1082_v18 = vpack.c.bf16 %v1071_v15, %v1071_v15  ;;  %v2423_v15 = vld [vmem:[#allocation5 + $0x68] sm:$0xf]  ;;  %v2388_v9 = vor.u32 %v2671_v38, %v2385_v44 }
 0x19d   : > { %1615 = vmatpush.bf16.msra.mxu1 %v2420_v20 }
 0x19e   : > { %1283 = vmatmul.bf16.vlgmr.msrb.gmra.mxu0 %v1082_v18  ;;  %1296 = vmatmul.bf16.vlgmr.msrb.gmra.mxu1 %v1082_v18 }
 0x19f   : > { %1309 = vmatmul.bf16.vlgmr.msrb.gmra.mxu2 %v1082_v18  ;;  %1322 = vmatmul.bf16.vlgmr.msrb.gmra.mxu3 %v1082_v18  ;;  %v2682_v18 = vld [vmem:[#allocation5 + $0x74] sm:$0xf0] }
 0x1a0   : > { %1601 = vmatpush.bf16.msra.mxu0 %v2432_v62  ;;  %v2424_v21 = vor.u32 %v2682_v18, %v2423_v15  ;;  %v2367_v62 = vld [vmem:[#allocation5] sm:$0xf] }
 0x1a1   : > { %1616 = vmatpush.bf16.msra.mxu1 %v2404_v32  ;;  %v2368_v1 = vor.u32 %v2669_v63, %v2367_v62 }
 0x1a2   : > { %1628 = vmatpush.bf16.msra.mxu2 %v2424_v21 }
 0x1a4   : > { %1602 = vmatpush.bf16.msra.mxu0 %v2416_v13  ;;  %v2668_v13 = vld [vmem:[#allocation5 + $0xc] sm:$0xf] }
 0x1a5   : > { %1617 = vmatpush.bf16.msra.mxu1 %v2388_v9 }
 0x1a8   : > { %1603 = vmatpush.bf16.msra.mxu0 %v2400_v30 }
 0x1a9   : > { %1618 = vmatpush.bf16.msra.mxu1 %v2372_v8 }
 0x1ac   : > { %1604 = vmatpush.bf16.msra.mxu0 %v2384_v43 }
 0x1b0   : > { %1605 = vmatpush.bf16.msra.mxu0 %v2368_v1 }
 0x21b   : > { %v1284_v12 = vpop.f32.mrf.mxu0  ;;  %v1297_v19 = vpop.f32.mrf.mxu1 }
 0x21c   : > { %v1327_v23 = vadd.f32 %v1284_v12, %v3081_v10  ;;  %v1328_v25 = vadd.f32 %v1297_v19, %v3084_v16  ;;  %v2408_v10 = vor.u32 %v2678_v35, %v2407_v33  ;;  %v2409_v16 = vld [vmem:[#allocation5 + $0x58] sm:$0xf0]  ;;  %v2380_v12 = vor.u32 %v2668_v13, %v2377_v14 }
 0x21d   : > { %v2412_v50 = vor.u32 %v2676_v36, %v2409_v16 }
 0x21e   : > { %v2362_v52 = vmul.f32 -1.442695, %v1327_v23  ;;  %v2363_v29 = vmul.f32 -1.442695, %v1328_v25  ;;  %1629 = vmatpush.bf16.msra.mxu2 %v2408_v10 }
 0x21f   : > { %1642 = vmatpush.bf16.msra.mxu3 %v2412_v50 }
 0x220   : > { %2788 = vpow2.f32 %v2362_v52 }
 0x221   : > { %2790 = vpow2.f32 %v2363_v29 }
 0x222   : > { %v1310_v39 = vpop.f32.mrf.mxu2  ;;  %v1323_v40 = vpop.f32.mrf.mxu3  ;;  %1630 = vmatpush.bf16.msra.mxu2 %v2392_v51 }
 0x223   : > { %v1329_v47 = vadd.f32 %v1310_v39, %v3087_v34  ;;  %v1286_v57 = vpop.f32.mrf.mxu0  ;;  %v1299_v59 = vpop.f32.mrf.mxu1  ;;  %1643 = vmatpush.bf16.msra.mxu3 %v2396_v60  ;;  %v1330_v22 = vadd.f32 %v1323_v40, %v3090_v41 }
 0x225   : > { %v2364_v58 = vmul.f32 -1.442695, %v1329_v47 }
 0x226   : > { %v2789_v0 = vpop.eup %2788  ;;  %1631 = vmatpush.bf16.msra.mxu2 %v2376_v61 }
 0x227   : > { %v2791_v34 = vpop.eup %2790  ;;  %v1340_v7 = vadd.f32 1.0, %v2789_v0  ;;  %2792 = vpow2.f32 %v2364_v58  ;;  %1644 = vmatpush.bf16.msra.mxu3 %v2380_v12 }
 0x228   : > { %v1341_v53 = vadd.f32 1.0, %v2791_v34 }
 0x229   : > { %2794 = vrcp.f32 %v1340_v7  ;;  %v1354_v28 = vand.u32 2147483648, %v1340_v7  ;;  %v1352_v29 = vand.u32 2147483647, %v1340_v7  ;;  %vm1348_vm11 = vweird.f32 %v1340_v7 }
 0x22a   : > { %2796 = vrcp.f32 %v1341_v53  ;;  %v1312_v15 = vpop.f32.mrf.mxu2  ;;  %v1325_v18 = vpop.f32.mrf.mxu3  ;;  %v1369_v49 = vand.u32 2147483648, %v1341_v53  ;;  %v1367_v31 = vand.u32 2147483647, %v1341_v53  ;;  %vm1363_vm12 = vweird.f32 %v1341_v53 }
 0x22b   : > { %v1355_v35 = vor.u32 1.1754944e-38, %v1354_v28  ;;  %vm1353_vm15 = vcmp.eq.f32.partialorder %v1352_v29, 8.507059e+37 }
 0x22c   : > { %v1370_v10 = vor.u32 1.1754944e-38, %v1369_v49  ;;  %vm1368_vm0 = vcmp.eq.f32.partialorder %v1367_v31, 8.507059e+37 }
 0x22d   : > { %v2793_v19 = vpop.eup %2792 }
 0x22e   : > { %v1342_v20 = vadd.f32 1.0, %v2793_v19 }
 0x22f   : > { %v2795_v21 = vpop.eup %2794 }
 0x230   : > { %v2797_v2 = vpop.eup %2796  ;;  %v1344_v23 = vmul.f32 %v2795_v21, %v1340_v7  ;;  %2798 = vrcp.f32 %v1342_v20  ;;  %vm1349_vm9 = vweird.f32 %v2795_v21  ;;  %v1384_v47 = vand.u32 2147483648, %v1342_v20 }
 0x231   : > { %v1359_v25 = vmul.f32 %v2797_v2, %v1341_v53  ;;  %2800 = vtanh.f32 %v1330_v22  ;;  %vm1364_vm10 = vweird.f32 %v2797_v2  ;;  %vm1350_vm13 = vmor %vm1348_vm11, %vm1349_vm9  ;;  %vm1378_vm2 = vweird.f32 %v1342_v20 }
 0x232   : > { %v1345_v26 = vsub.f32 1.0, %v1344_v23  ;;  %vm1365_vm14 = vmor %vm1363_vm12, %vm1364_vm10  ;;  %v1382_v57 = vand.u32 2147483647, %v1342_v20  ;;  %v1385_v9 = vor.u32 1.1754944e-38, %v1384_v47 }
 0x233   : > { %v1360_v27 = vsub.f32 1.0, %v1359_v25 }
 0x234   : > { %v1346_v52 = vmul.f32 %v2795_v21, %v1345_v26  ;;  %vm1383_vm4 = vcmp.eq.f32.partialorder %v1382_v57, 8.507059e+37 }
 0x235   : > { %v1361_v30 = vmul.f32 %v2797_v2, %v1360_v27 }
 0x236   : > { %v2799_v32 = vpop.eup %2798  ;;  %v1347_v33 = vadd.f32 %v2795_v21, %v1346_v52 }
 0x237   : > { %v1374_v41 = vmul.f32 %v2799_v32, %v1342_v20  ;;  %v1362_v36 = vadd.f32 %v2797_v2, %v1361_v30  ;;  %v2801_v50 = vpop.eup %2800  ;;  %vm1379_vm1 = vweird.f32 %v2799_v32 }
 0x238   : > { %v1351_v16 = vsel %vm1350_vm13, %v2795_v21, %v1347_v33  ;;  %vm1380_vm3 = vmor %vm1378_vm2, %vm1379_vm1 }
 0x239   : > { %v1375_v54 = vsub.f32 1.0, %v1374_v41  ;;  %v1356_v37 = vsel %vm1353_vm15, %v1355_v35, %v1351_v16  ;;  %v1366_v38 = vsel %vm1365_vm14, %v2797_v2, %v1362_v36 }
 0x23a   : > { %v1371_v39 = vsel %vm1368_vm0, %v1370_v10, %v1366_v38  ;;  %v1391_v40 = vmul.f32 %v2801_v50, %v1356_v37 }
 0x23b   : > { %v1376_v43 = vmul.f32 %v2799_v32, %v1375_v54  ;;  %v1390_v44 = vmul.f32 %v1371_v39, %v3120_v6 }
 0x23d   : > { %v3128_v45 = vadd.f32 %v1391_v40, %v1390_v44  ;;  %v1377_v46 = vadd.f32 %v2799_v32, %v1376_v43 }
 0x23f   : > { %2802 = vtanh.f32 %v3128_v45  ;;  %v1381_v59 = vsel %vm1380_vm3, %v2799_v32, %v1377_v46 }
 0x240   : > { %v1386_v56 = vsel %vm1383_vm4, %v1385_v9, %v1381_v59 }
 0x245   : > { %v2803_v51 = vpop.eup %2802 }
 0x246   : > { %v1394_v55 = vmul.f32 %v2803_v51, %v1386_v56 }
 0x248   : > { %v1405_v60 = vpack.c.bf16 %v1394_v55, %v1394_v55 }
 0x24a   : > { %1606 = vmatmul.bf16.vlgmr.msra.gmra.mxu0 %v1405_v60  ;;  %1619 = vmatmul.bf16.vlgmr.msra.gmra.mxu1 %v1405_v60 }
 0x24b   : > { %1632 = vmatmul.bf16.vlgmr.msra.gmra.mxu2 %v1405_v60  ;;  %1645 = vmatmul.bf16.vlgmr.msra.gmra.mxu3 %v1405_v60 }
 0x2c7   : > { %v1607_v6 = vpop.f32.mrf.mxu0  ;;  %v1620_v58 = vpop.f32.mrf.mxu1 }
 0x2c8   : > { %v1650_v62 = vadd.f32 %v1607_v6, %v3093_v42  ;;  %v1651_v63 = vadd.f32 %v1620_v58, %v3096_v48 }
 0x2ca   : > { %v2493_v0 = vmul.f32 -1.442695, %v1650_v62  ;;  %v2494_v1 = vmul.f32 -1.442695, %v1651_v63 }
 0x2cc   : > { %2804 = vpow2.f32 %v2493_v0 }
 0x2cd   : > { %2806 = vpow2.f32 %v2494_v1 }
 0x2ce   : > { %v1633_v3 = vpop.f32.mrf.mxu2  ;;  %v1646_v4 = vpop.f32.mrf.mxu3 }
 0x2cf   : > { %v1652_v5 = vadd.f32 %v1633_v3, %v3101_v17  ;;  %v1609_v34 = vpop.f32.mrf.mxu0  ;;  %v1622_v7 = vpop.f32.mrf.mxu1  ;;  %v1653_v12 = vadd.f32 %v1646_v4, %v3106_v24 }
 0x2d1   : > { %v2495_v8 = vmul.f32 -1.442695, %v1652_v5 }
 0x2d2   : > { %v2805_v11 = vpop.eup %2804 }
 0x2d3   : > { %v2807_v53 = vpop.eup %2806  ;;  %v1663_v61 = vadd.f32 1.0, %v2805_v11  ;;  %2808 = vpow2.f32 %v2495_v8 }
 0x2d4   : > { %v1664_v13 = vadd.f32 1.0, %v2807_v53 }
 0x2d5   : > { %2810 = vrcp.f32 %v1663_v61  ;;  %v1677_v2 = vand.u32 2147483648, %v1663_v61  ;;  %v1675_v26 = vand.u32 2147483647, %v1663_v61  ;;  %vm1671_vm7 = vweird.f32 %v1663_v61 }
 0x2d6   : > { %2812 = vrcp.f32 %v1664_v13  ;;  %v1635_v42 = vpop.f32.mrf.mxu2  ;;  %v1648_v48 = vpop.f32.mrf.mxu3  ;;  %v1692_v23 = vand.u32 2147483648, %v1664_v13  ;;  %v1690_v28 = vand.u32 2147483647, %v1664_v13  ;;  %vm1686_vm8 = vweird.f32 %v1664_v13 }
 0x2d7   : > { %v1678_v29 = vor.u32 1.1754944e-38, %v1677_v2  ;;  %vm1676_vm11 = vcmp.eq.f32.partialorder %v1675_v26, 8.507059e+37 }
 0x2d8   : > { %v1693_v31 = vor.u32 1.1754944e-38, %v1692_v23  ;;  %vm1691_vm12 = vcmp.eq.f32.partialorder %v1690_v28, 8.507059e+37 }
 0x2d9   : > { %v2809_v14 = vpop.eup %2808 }
 0x2da   : > { %v1665_v15 = vadd.f32 1.0, %v2809_v14 }
 0x2db   : > { %v2811_v18 = vpop.eup %2810 }
 0x2dc   : > { %v2813_v19 = vpop.eup %2812  ;;  %v1667_v20 = vmul.f32 %v2811_v18, %v1663_v61  ;;  %2814 = vrcp.f32 %v1665_v15  ;;  %vm1672_vm5 = vweird.f32 %v2811_v18  ;;  %v1707_v39 = vand.u32 2147483648, %v1665_v15 }
 0x2dd   : > { %v1682_v17 = vmul.f32 %v2813_v19, %v1664_v13  ;;  %2816 = vtanh.f32 %v1653_v12  ;;  %vm1687_vm6 = vweird.f32 %v2813_v19  ;;  %vm1673_vm9 = vmor %vm1671_vm7, %vm1672_vm5  ;;  %vm1701_vm14 = vweird.f32 %v1665_v15 }
 0x2de   : > { %v1668_v21 = vsub.f32 1.0, %v1667_v20  ;;  %vm1688_vm10 = vmor %vm1686_vm8, %vm1687_vm6  ;;  %v1705_v40 = vand.u32 2147483647, %v1665_v15  ;;  %v1708_v44 = vor.u32 1.1754944e-38, %v1707_v39 }
 0x2df   : > { %v1683_v22 = vsub.f32 1.0, %v1682_v17 }
 0x2e0   : > { %v1669_v25 = vmul.f32 %v2811_v18, %v1668_v21  ;;  %vm1706_vm0 = vcmp.eq.f32.partialorder %v1705_v40, 8.507059e+37 }
 0x2e1   : > { %v1684_v27 = vmul.f32 %v2813_v19, %v1683_v22 }
 0x2e2   : > { %v2815_v49 = vpop.eup %2814  ;;  %v1670_v52 = vadd.f32 %v2811_v18, %v1669_v25 }
 0x2e3   : > { %v1697_v24 = vmul.f32 %v2815_v49, %v1665_v15  ;;  %v1685_v30 = vadd.f32 %v2813_v19, %v1684_v27  ;;  %v2817_v33 = vpop.eup %2816  ;;  %vm1702_vm13 = vweird.f32 %v2815_v49 }
 0x2e4   : > { %v1674_v32 = vsel %vm1673_vm9, %v2811_v18, %v1670_v52  ;;  %vm1703_vm15 = vmor %vm1701_vm14, %vm1702_vm13 }
 0x2e5   : > { %v1698_v41 = vsub.f32 1.0, %v1697_v24  ;;  %v1679_v35 = vsel %vm1676_vm11, %v1678_v29, %v1674_v32  ;;  %v1689_v36 = vsel %vm1688_vm10, %v2813_v19, %v1685_v30 }
 0x2e6   : > { %v1694_v10 = vsel %vm1691_vm12, %v1693_v31, %v1689_v36  ;;  %v1714_v16 = vmul.f32 %v2817_v33, %v1679_v35 }
 0x2e7   : > { %v1699_v50 = vmul.f32 %v2815_v49, %v1698_v41  ;;  %v1713_v54 = vmul.f32 %v1694_v10, %v3128_v45 }
 0x2e9   : > { %v1715_v37 = vadd.f32 %v1714_v16, %v1713_v54  ;;  %v1700_v38 = vadd.f32 %v2815_v49, %v1699_v50 }
 0x2eb   : > { %2818 = vtanh.f32 %v1715_v37  ;;  %1718 = vst [vmem:[#allocation3] sm:$0xff] %v1715_v37  ;;  %v1704_v43 = vsel %vm1703_vm15, %v2815_v49, %v1700_v38 }
 0x2ec   : > { %v1709_v47 = vsel %vm1706_vm0, %v1708_v44, %v1704_v43 }
 0x2f0   : > { %1723 = sbr.rel (%p2496_p8) target bundleno = 926 (0x39e), region = 60 }
 0x2f1   : > { %v2819_v46 = vpop.eup %2818 }
 0x2f2   : > { %v1717_v57 = vmul.f32 %v2819_v46, %v1709_v47 }
 0x2f4   : > { %1719 = vst [vmem:[#allocation2] sm:$0xff] %v1717_v57 }
 0x2f5   : > { %v2555_v45 = vld [vmem:[#allocation8 + $0x70] sm:$0xf]  ;;  %v2714_v59 = vld [vmem:[#allocation8 + $0x74] sm:$0xf0]  ;;  %v2713_v9 = vld [vmem:[#allocation8 + $0x74] sm:$0xf] }
 0x2f6   : > { %v2556_v51 = vor.u32 %v2714_v59, %v2555_v45  ;;  %v2557_v56 = vld [vmem:[#allocation8 + $0x78] sm:$0xf0]  ;;  %v2547_v55 = vld [vmem:[#allocation8 + $0x60] sm:$0xf]  ;;  %v2712_v60 = vld [vmem:[#allocation8 + $0x64] sm:$0xf0] }
 0x2f7   : > { %v2560_v6 = vor.u32 %v2713_v9, %v2557_v56  ;;  %v2711_v58 = vld [vmem:[#allocation8 + $0x64] sm:$0xf]  ;;  %v2549_v62 = vld [vmem:[#allocation8 + $0x68] sm:$0xf0]  ;;  %v2548_v63 = vor.u32 %v2712_v60, %v2547_v55  ;;  %v2539_v1 = vld [vmem:[#allocation8 + $0x50] sm:$0xf] }
 0x2f8   : > { %1828 = vmatpush.bf16.msra.mxu0 %v2556_v51  ;;  %v2552_v0 = vor.u32 %v2711_v58, %v2549_v62  ;;  %v2710_v3 = vld [vmem:[#allocation8 + $0x54] sm:$0xf0]  ;;  %v2709_v4 = vld [vmem:[#allocation8 + $0x54] sm:$0xf]  ;;  %v2541_v5 = vld [vmem:[#allocation8 + $0x58] sm:$0xf0] }
 0x2f9   : > { %1841 = vmatpush.bf16.msra.mxu1 %v2560_v6  ;;  %v2540_v34 = vor.u32 %v2710_v3, %v2539_v1  ;;  %v2544_v7 = vor.u32 %v2709_v4, %v2541_v5  ;;  %v2531_v8 = vld [vmem:[#allocation8 + $0x40] sm:$0xf]  ;;  %v2708_v11 = vld [vmem:[#allocation8 + $0x44] sm:$0xf0]  ;;  %v2707_v53 = vld [vmem:[#allocation8 + $0x44] sm:$0xf] }
 0x2fa   : > { %v2533_v61 = vld [vmem:[#allocation8 + $0x48] sm:$0xf0]  ;;  %v2532_v13 = vor.u32 %v2708_v11, %v2531_v8  ;;  %v2523_v48 = vld [vmem:[#allocation8 + $0x30] sm:$0xf]  ;;  %v2706_v14 = vld [vmem:[#allocation8 + $0x34] sm:$0xf0] }
 0x2fb   : > { %v2536_v42 = vor.u32 %v2707_v53, %v2533_v61  ;;  %v2705_v15 = vld [vmem:[#allocation8 + $0x34] sm:$0xf]  ;;  %v2525_v18 = vld [vmem:[#allocation8 + $0x38] sm:$0xf0]  ;;  %v2524_v12 = vor.u32 %v2706_v14, %v2523_v48  ;;  %v2515_v20 = vld [vmem:[#allocation8 + $0x20] sm:$0xf] }
 0x2fc   : > { %1829 = vmatpush.bf16.msra.mxu0 %v2548_v63  ;;  %v2528_v19 = vor.u32 %v2705_v15, %v2525_v18  ;;  %v2704_v17 = vld [vmem:[#allocation8 + $0x24] sm:$0xf0]  ;;  %v2703_v21 = vld [vmem:[#allocation8 + $0x24] sm:$0xf]  ;;  %v2517_v22 = vld [vmem:[#allocation8 + $0x28] sm:$0xf0] }
 0x2fd   : > { %1842 = vmatpush.bf16.msra.mxu1 %v2552_v0  ;;  %v2516_v2 = vor.u32 %v2704_v17, %v2515_v20  ;;  %v2520_v23 = vor.u32 %v2703_v21, %v2517_v22  ;;  %v2507_v25 = vld [vmem:[#allocation8 + $0x10] sm:$0xf]  ;;  %v2702_v26 = vld [vmem:[#allocation8 + $0x14] sm:$0xf0]  ;;  %v2701_v27 = vld [vmem:[#allocation8 + $0x14] sm:$0xf] }
 0x2fe   : > { %v2509_v28 = vld [vmem:[#allocation8 + $0x18] sm:$0xf0]  ;;  %v2508_v49 = vor.u32 %v2702_v26, %v2507_v25  ;;  %v2499_v24 = vld [vmem:[#allocation8] sm:$0xf]  ;;  %v2700_v29 = vld [vmem:[#allocation8 + $0x4] sm:$0xf0] }
 0x2ff   : > { %v2512_v52 = vor.u32 %v2701_v27, %v2509_v28  ;;  %v2699_v30 = vld [vmem:[#allocation8 + $0x4] sm:$0xf]  ;;  %v2501_v31 = vld [vmem:[#allocation8 + $0x8] sm:$0xf0]  ;;  %v2500_v32 = vor.u32 %v2700_v29, %v2499_v24  ;;  %v1724_v33 = vld [vmem:[#allocation2] sm:$0xff] }
 0x300   : > { %1830 = vmatpush.bf16.msra.mxu0 %v2540_v34  ;;  %v2504_v41 = vor.u32 %v2699_v30, %v2501_v31  ;;  %v1725_v35 = vpack.c.bf16 %v1724_v33, %v1724_v33  ;;  %v1742_v36 = vld [vmem:[%s3152_s5] sm:$0x3] }
 0x301   : > { %1843 = vmatpush.bf16.msra.mxu1 %v2544_v7  ;;  %v1744_v10 = vperm.slane %v1742_v36, 0  ;;  %v1745_v16 = vperm.slane %v1742_v36, 1 }
 0x304   : > { %1831 = vmatpush.bf16.msra.mxu0 %v2532_v13 }
 0x305   : > { %1844 = vmatpush.bf16.msra.mxu1 %v2536_v42 }
 0x308   : > { %1832 = vmatpush.bf16.msra.mxu0 %v2524_v12 }
 0x309   : > { %1845 = vmatpush.bf16.msra.mxu1 %v2528_v19 }
 0x30c   : > { %1833 = vmatpush.bf16.msra.mxu0 %v2516_v2 }
 0x30d   : > { %1846 = vmatpush.bf16.msra.mxu1 %v2520_v23 }
 0x310   : > { %1834 = vmatpush.bf16.msra.mxu0 %v2508_v49 }
 0x311   : > { %1847 = vmatpush.bf16.msra.mxu1 %v2512_v52 }
 0x314   : > { %1835 = vmatpush.bf16.msra.mxu0 %v2500_v32 }
 0x315   : > { %1848 = vmatpush.bf16.msra.mxu1 %v2504_v41 }
 0x317   : > { %1836 = vmatmul.bf16.vlgmr.msra.gmra.mxu0 %v1725_v35 }
 0x318   : > { %1849 = vmatmul.bf16.vlgmr.msra.gmra.mxu1 %v1725_v35 }
 0x394   : > { %v1837_v50 = vpop.f32.mrf.mxu0 }
 0x395   : > { %v1838_v54 = vadd.f32 %v1837_v50, %v1744_v10  ;;  %v1850_v37 = vpop.f32.mrf.mxu1 }
 0x396   : > { %v1851_v38 = vadd.f32 %v1850_v37, %v1745_v16 }
 0x397   : > { %1854 = vst [vmem:[#allocation10] sm:$0xff] %v1838_v54 }
 0x398   : > { %1855 = vst [vmem:[#allocation10 + $0x8] sm:$0xff] %v1851_v38 }
 0x39c   : > { %v1839_v39 = vpop.f32.mrf.mxu0 }
 0x39d   : > { %v1852_v40 = vpop.f32.mrf.mxu1 }
 0x39e PF: > { %p2738_p9 = scmp.eq.s32.totalorder %s2980_s25, 1  ;;  %s2935_s17 = smov [#allocation10]  }
 0x39f   : > { %s1862_s18 = sshll.u32 %s2935_s17, 4  ;;  %s1864_s22 = sshll.u32 %s3153_s6, 4  ;;  %s1863_s18 = int_to_ptr.vmem [resolvable:$true] %s1862_s18  ;;  %s1865_s22 = int_to_ptr.hbm [resolvable:$true] %s1864_s22 }
 0x3a0   : > { %2724 = dma.vmem_to_hbm [thread:$0]  (%p2738_p9), %s1863_s18, 256, %s1865_s22, [#allocation7]  }
 0x3a1   : > { %2921 = dma.done.wait (%p2738_p9), [#allocation7], 256  }
 0x3a2   : > { %2923 = vsyncadd (%p2738_p9), [#allocation7], 4294967040 }
 0x3a3 PF: > { %s19_s21 = sadd.s32 1, %s2926_s21  }
 0x3a4   : > { %p16_p10 = scmp.ge.s32.totalorder %s19_s21, 4  }
 0x3a6   :  { %18 = sbr.rel (!%p16_p10) target bundleno = 3 (0x3), region = 92 }
 0x3ab   :  { %1878 = vsyncpa [#allocation6], 1 }
 0x3ac   :  { %1880 = vsyncpa [#allocation6 + $0x1], 1 }
 0x3ad   :  { %1881 = vsyncpa [#allocation9], 1 }
 0x3ae   :  { %1882 = vsyncpa [#allocation7], 1 }
 0x3af   :  { %1884 = vsyncpa [#allocation7 + $0x1], 1 }

</bundles_post_ra>
